<compile_context>
chip_gen: v7x
topology: tpu7x:2x2x1
jax: 0.10.0
libtpu: 0.0.40
codegen_flags: <defaults>
</compile_context>

<pallas_src>
import functools

import jax
import jax.numpy as jnp
from jax.experimental import pallas as pl
from jax.experimental.pallas import tpu as pltpu


def _round_up(v, m):
    return ((v + m - 1) // m) * m


def _log_softmax(v):
    m = jnp.max(v, axis=1, keepdims=True)
    s = v - m
    lse = jnp.log(jnp.sum(jnp.exp(s), axis=1, keepdims=True))
    return s - lse


# ----------------------------------------------------------------------------
# One fused "level": GCN layer k + LPA iteration k, row-tiled over A.
#
#   h_out = act( deg_inv * (A_tile @ (H @ W)) + b )
#   y_out = maybe_log_softmax( deg_inv * (A_tile @ Y) )
# ----------------------------------------------------------------------------
def gcn_lpa_level_kernel(a_ref, deg_ref, h_ref, w_ref, b_ref, y_ref,
                         h_out_ref, y_out_ref, *, activation):
    # Dense H @ W (tiny: [Np, F_in] @ [F_in, F_out]); recomputed per row tile,
    # ~10% of the tile's A-matmul FLOPs -- cheaper than an extra launch.
    hw = jnp.dot(h_ref[...], w_ref[...], preferred_element_type=jnp.float32)

    a = a_ref[...]                                        # [TM, Np] bf16
    agg_h = jnp.dot(a, hw.astype(jnp.bfloat16),
                    preferred_element_type=jnp.float32)   # [TM, F_out] f32
    agg_y = jnp.dot(a, y_ref[...],
                    preferred_element_type=jnp.float32)   # [TM, C]     f32

    deg = deg_ref[...]                                    # [TM, 1] f32
    deg_inv = jnp.where(deg == 0.0, 0.0, pl.reciprocal(deg, approx=True))

    out_h = agg_h * deg_inv + b_ref[...]                  # bias after agg
    out_y = agg_y * deg_inv

    if activation == "relu":
        out_h = jnp.maximum(out_h, 0.0)
    elif activation == "log_softmax":
        out_h = _log_softmax(out_h)
        out_y = _log_softmax(out_y)

    h_out_ref[...] = out_h.astype(h_out_ref.dtype)
    y_out_ref[...] = out_y.astype(y_out_ref.dtype)


def gcn_lpa_level(a, deg, h, w, b, y, *, activation, tile_m, out_dtype):
    np_ = a.shape[0]
    f_in = h.shape[1]
    f_out = w.shape[1]
    c = y.shape[1]
    grid = (np_ // tile_m,)
    kernel = functools.partial(gcn_lpa_level_kernel, activation=activation)
    return pl.pallas_call(
        kernel,
        out_shape=(jax.ShapeDtypeStruct((np_, f_out), out_dtype),
                   jax.ShapeDtypeStruct((np_, c), out_dtype)),
        grid=grid,
        in_specs=[
            pl.BlockSpec((tile_m, np_), lambda i: (i, 0)),   # A row tile (bf16)
            pl.BlockSpec((tile_m, 1), lambda i: (i, 0)),     # deg row tile
            pl.BlockSpec((np_, f_in), lambda i: (0, 0)),     # H (VMEM-resident)
            pl.BlockSpec((f_in, f_out), lambda i: (0, 0)),   # W
            pl.BlockSpec((1, f_out), lambda i: (0, 0)),      # b
            pl.BlockSpec((np_, c), lambda i: (0, 0)),        # Y (VMEM-resident)
        ],
        out_specs=(
            pl.BlockSpec((tile_m, f_out), lambda i: (i, 0)),
            pl.BlockSpec((tile_m, c), lambda i: (i, 0)),
        ),
        compiler_params=pltpu.CompilerParams(
            dimension_semantics=("parallel",),   # megacore row split on v7x
            vmem_limit_bytes=64 * 1024 * 1024,
        ),
    )(a, deg, h, w, b, y)


# ----------------------------------------------------------------------------
# Full forward pass (eval mode: dropout is identity).
# ----------------------------------------------------------------------------
def net_forward(x, row, col, y_labels, train_mask, params, *, tile_m=256):
    n, f_in = x.shape
    num_classes = params["W5"].shape[1]

    tm = min(tile_m, _round_up(n, 128))
    np_ = _round_up(n, tm)

    # --- plain-JAX glue: edge scatter -> dense adjacency and degree ----------
    w_edge = params["weights_layer"].astype(jnp.float32)
    a_raw = jnp.zeros((np_, np_), jnp.float32).at[col, row].add(w_edge)
    a_raw = a_raw.astype(jnp.bfloat16)                      # bf16 MXU operand
    deg = jnp.zeros((np_,), jnp.float32).at[col].add(w_edge).reshape(np_, 1)

    x_p = jnp.zeros((np_, f_in), jnp.bfloat16).at[:n].set(
        x.astype(jnp.bfloat16))

    # TODO(synk): LPA_custom semantics inferred from the GCN-LPA paper:
    #   Y_{k+1} = A_norm @ Y_k, starting from train-masked one-hot labels.
    y0 = jax.nn.one_hot(y_labels, num_classes, dtype=jnp.float32)
    y0 = y0 * train_mask.astype(jnp.float32)[:, None]
    y0_p = jnp.zeros((np_, num_classes), jnp.bfloat16).at[:n].set(
        y0.astype(jnp.bfloat16))

    w1 = params["W1"].astype(jnp.bfloat16)
    w2 = params["W2"].astype(jnp.bfloat16)
    w5 = params["W5"].astype(jnp.bfloat16)
    b1 = params["b1"].astype(jnp.float32)
    b2 = params["b2"].astype(jnp.float32)
    b5 = params["b5"].astype(jnp.float32)

    # level 1: conv1 + relu (+ dropout=identity in eval) | LPA iter 1
    h1, y1 = gcn_lpa_level(a_raw, deg, x_p, w1, b1, y0_p,
                           activation="relu", tile_m=tm,
                           out_dtype=jnp.bfloat16)
    # level 2: conv2 + relu (+ dropout=identity in eval) | LPA iter 2
    h2, y2 = gcn_lpa_level(a_raw, deg, h1, w2, b2, y1,
                           activation="relu", tile_m=tm,
                           out_dtype=jnp.bfloat16)
    # level 3: conv5 + log_softmax | LPA iter 3 + log_softmax
    logits, lpa_out = gcn_lpa_level(a_raw, deg, h2, w5, b5, y2,
                                    activation="log_softmax", tile_m=tm,
                                    out_dtype=jnp.float32)

    return logits[:n], lpa_out[:n]


if __name__ == "__main__":
    key = jax.random.PRNGKey(0)

    # Small synthetic "Cora-like" graph.
    N = 128        # num nodes
    F_IN = 32      # dataset.num_node_features (synthetic)
    HID = 32       # hidden width of GCNConv_custom layers
    C = 8          # dataset.num_classes (synthetic)
    E = 512        # edges before self-loops

    k = jax.random.split(key, 8)
    x = jax.random.normal(k[0], (N, F_IN), dtype=jnp.float32)
    src = jax.random.randint(k[1], (E,), 0, N)
    dst = jax.random.randint(k[2], (E,), 0, N)
    y_labels = jax.random.randint(k[3], (N,), 0, C)
    train_mask = jax.random.bernoulli(k[4], 0.3, (N,))

    # add_self_loops(edge_index, num_nodes=N)
    loops = jnp.arange(N, dtype=src.dtype)
    row = jnp.concatenate([src, loops])   # edge_index[0] (source)
    col = jnp.concatenate([dst, loops])   # edge_index[1] (target)
    num_edges = int(row.shape[0])         # == Net.__init__'s num_edges

    # Deterministic parameter init (matches __init__ shapes).
    def glorot(kk, fan_in, fan_out):
        lim = (6.0 / (fan_in + fan_out)) ** 0.5
        return jax.random.uniform(kk, (fan_in, fan_out), jnp.float32, -lim, lim)

    kp = jax.random.split(k[5], 3)
    params = {
        "weights_layer": jnp.ones((num_edges,), jnp.float32),  # torch.ones(num_edges)
        "W1": glorot(kp[0], F_IN, HID), "b1": jnp.zeros((1, HID), jnp.float32),
        "W2": glorot(kp[1], HID, HID),  "b2": jnp.zeros((1, HID), jnp.float32),
        "W5": glorot(kp[2], HID, C),    "b5": jnp.zeros((1, C), jnp.float32),
        # conv3 / conv4 are defined in __init__ but unused in forward().
    }

    fwd = jax.jit(net_forward)
    logits, lpa_out = fwd(x, row, col, y_labels, train_mask, params)
    jax.block_until_ready((logits, lpa_out))

    assert logits.shape == (N, C) and lpa_out.shape == (N, C)
    assert bool(jnp.all(jnp.isfinite(logits))) and bool(jnp.all(jnp.isfinite(lpa_out)))
    print("KERNEL_OK")
</pallas_src>

<mosaic_0001>
module attributes {stable_mosaic.version = 11 : i64} {
  func.func private @main(%arg0: i32) attributes {dimension_semantics = [#tpu.dimension_semantics<core_parallel>], iteration_bounds = array<i64: 2>, tpu.core_type = #tpu.core_type<sc_scalar_subcore>, window_params = []} {
    return
  }
}

module attributes {stable_mosaic.version = 11 : i64} {
  func.func private @main(%arg0: i32) attributes {dimension_semantics = [#tpu.dimension_semantics<core_parallel>], iteration_bounds = array<i64: 2>, tpu.core_type = #tpu.core_type<sc_scalar_subcore>, window_params = []} {
    return
  }
}

module attributes {stable_mosaic.version = 11 : i64} {
  func.func @gcn_lpa_level_kernel(%arg0: i32, %arg1: memref<128x128xbf16, #tpu.memory_space<vmem>>, %arg2: memref<128x1xf32, #tpu.memory_space<vmem>>, %arg3: memref<128x32xbf16, #tpu.memory_space<vmem>>, %arg4: memref<32x8xbf16, #tpu.memory_space<vmem>>, %arg5: memref<1x8xf32, #tpu.memory_space<vmem>>, %arg6: memref<128x8xbf16, #tpu.memory_space<vmem>>, %arg7: memref<128x8xf32, #tpu.memory_space<vmem>>, %arg8: memref<128x8xf32, #tpu.memory_space<vmem>>) attributes {dimension_semantics = [#tpu.dimension_semantics<parallel>], iteration_bounds = array<i64: 1>, scalar_prefetch = 0 : i64, scratch_operands = 0 : i64, tpu.core_type = #tpu.core_type<tc>, window_params = [{transform_indices = @transform_0, window_bounds = array<i64: 128, 128>}, {transform_indices = @transform_1, window_bounds = array<i64: 128, 1>}, {pipeline_mode = #tpu.pipeline_mode<synchronous>, transform_indices = @transform_2, window_bounds = array<i64: 128, 32>}, {pipeline_mode = #tpu.pipeline_mode<synchronous>, transform_indices = @transform_3, window_bounds = array<i64: 32, 8>}, {pipeline_mode = #tpu.pipeline_mode<synchronous>, transform_indices = @transform_4, window_bounds = array<i64: 1, 8>}, {pipeline_mode = #tpu.pipeline_mode<synchronous>, transform_indices = @transform_5, window_bounds = array<i64: 128, 8>}, {transform_indices = @transform_6, window_bounds = array<i64: 128, 8>}, {transform_indices = @transform_7, window_bounds = array<i64: 128, 8>}]} {
    %c0 = arith.constant 0 : index
    %c0_0 = arith.constant 0 : index
    %0 = vector.load %arg3[%c0, %c0_0] : memref<128x32xbf16, #tpu.memory_space<vmem>>, vector<128x32xbf16>
    %c0_1 = arith.constant 0 : index
    %c0_2 = arith.constant 0 : index
    %1 = vector.load %arg4[%c0_1, %c0_2] : memref<32x8xbf16, #tpu.memory_space<vmem>>, vector<32x8xbf16>
    %cst = arith.constant dense<0.000000e+00> : vector<128x8xf32>
    %2 = tpu.matmul %0, %1, %cst {dimension_numbers = #tpu.dot_dimension_numbers<[1], [0], [0], [1], [0, 0, 1, 1], [], []>} : vector<128x32xbf16>, vector<32x8xbf16>, vector<128x8xf32> -> vector<128x8xf32>
    %c0_3 = arith.constant 0 : index
    %c0_4 = arith.constant 0 : index
    %3 = vector.load %arg1[%c0_3, %c0_4] : memref<128x128xbf16, #tpu.memory_space<vmem>>, vector<128x128xbf16>
    %4 = arith.truncf %2 : vector<128x8xf32> to vector<128x8xbf16>
    %cst_5 = arith.constant dense<0.000000e+00> : vector<128x8xf32>
    %5 = tpu.matmul %3, %4, %cst_5 {dimension_numbers = #tpu.dot_dimension_numbers<[1], [0], [0], [1], [0, 0, 1, 1], [], []>} : vector<128x128xbf16>, vector<128x8xbf16>, vector<128x8xf32> -> vector<128x8xf32>
    %c0_6 = arith.constant 0 : index
    %c0_7 = arith.constant 0 : index
    %6 = vector.load %arg6[%c0_6, %c0_7] : memref<128x8xbf16, #tpu.memory_space<vmem>>, vector<128x8xbf16>
    %cst_8 = arith.constant dense<0.000000e+00> : vector<128x8xf32>
    %7 = tpu.matmul %3, %6, %cst_8 {dimension_numbers = #tpu.dot_dimension_numbers<[1], [0], [0], [1], [0, 0, 1, 1], [], []>} : vector<128x128xbf16>, vector<128x8xbf16>, vector<128x8xf32> -> vector<128x8xf32>
    %c0_9 = arith.constant 0 : index
    %c0_10 = arith.constant 0 : index
    %8 = vector.load %arg2[%c0_9, %c0_10] : memref<128x1xf32, #tpu.memory_space<vmem>>, vector<128x1xf32>
    %cst_11 = arith.constant 0.000000e+00 : f32
    %9 = vector.broadcast %cst_11 : f32 to vector<128x1xf32>
    %10 = arith.cmpf oeq, %8, %9 : vector<128x1xf32>
    %11 = tpu.reciprocal %8 {approx = true} : vector<128x1xf32> -> vector<128x1xf32>
    %cst_12 = arith.constant 0.000000e+00 : f32
    %12 = vector.broadcast %cst_12 : f32 to vector<128x1xf32>
    %13 = arith.select %10, %12, %11 : vector<128x1xi1>, vector<128x1xf32>
    %14 = vector.broadcast %13 : vector<128x1xf32> to vector<128x8xf32>
    %15 = arith.mulf %5, %14 : vector<128x8xf32>
    %c0_13 = arith.constant 0 : index
    %c0_14 = arith.constant 0 : index
    %16 = vector.load %arg5[%c0_13, %c0_14] : memref<1x8xf32, #tpu.memory_space<vmem>>, vector<1x8xf32>
    %17 = vector.broadcast %16 : vector<1x8xf32> to vector<128x8xf32>
    %18 = arith.addf %15, %17 : vector<128x8xf32>
    %19 = vector.broadcast %13 : vector<128x1xf32> to vector<128x8xf32>
    %20 = arith.mulf %7, %19 : vector<128x8xf32>
    %cst_15 = arith.constant dense<0xFF800000> : vector<128xf32>
    %21 = vector.multi_reduction <maximumf>, %18, %cst_15 [1] : vector<128x8xf32> to vector<128xf32>
    %22 = vector.shape_cast %21 : vector<128xf32> to vector<128x1xf32>
    %23 = vector.broadcast %22 : vector<128x1xf32> to vector<128x8xf32>
    %24 = arith.subf %18, %23 : vector<128x8xf32>
    %25 = math.exp %24 : vector<128x8xf32>
    %cst_16 = arith.constant dense<0.000000e+00> : vector<128xf32>
    %26 = vector.multi_reduction <add>, %25, %cst_16 [1] : vector<128x8xf32> to vector<128xf32>
    %27 = vector.shape_cast %26 : vector<128xf32> to vector<128x1xf32>
    %28 = math.log %27 : vector<128x1xf32>
    %29 = vector.broadcast %28 : vector<128x1xf32> to vector<128x8xf32>
    %30 = arith.subf %24, %29 : vector<128x8xf32>
    %cst_17 = arith.constant dense<0xFF800000> : vector<128xf32>
    %31 = vector.multi_reduction <maximumf>, %20, %cst_17 [1] : vector<128x8xf32> to vector<128xf32>
    %32 = vector.shape_cast %31 : vector<128xf32> to vector<128x1xf32>
    %33 = vector.broadcast %32 : vector<128x1xf32> to vector<128x8xf32>
    %34 = arith.subf %20, %33 : vector<128x8xf32>
    %35 = math.exp %34 : vector<128x8xf32>
    %cst_18 = arith.constant dense<0.000000e+00> : vector<128xf32>
    %36 = vector.multi_reduction <add>, %35, %cst_18 [1] : vector<128x8xf32> to vector<128xf32>
    %37 = vector.shape_cast %36 : vector<128xf32> to vector<128x1xf32>
    %38 = math.log %37 : vector<128x1xf32>
    %39 = vector.broadcast %38 : vector<128x1xf32> to vector<128x8xf32>
    %40 = arith.subf %34, %39 : vector<128x8xf32>
    %c0_19 = arith.constant 0 : index
    %c0_20 = arith.constant 0 : index
    %41 = vector.load %arg7[%c0_19, %c0_20] : memref<128x8xf32, #tpu.memory_space<vmem>>, vector<128x8xf32>
    tpu.vector_store %arg7[%c0_19, %c0_20], %30 {strides = array<i32>} : memref<128x8xf32, #tpu.memory_space<vmem>>, vector<128x8xf32>,
    %c0_21 = arith.constant 0 : index
    %c0_22 = arith.constant 0 : index
    %42 = vector.load %arg8[%c0_21, %c0_22] : memref<128x8xf32, #tpu.memory_space<vmem>>, vector<128x8xf32>
    tpu.vector_store %arg8[%c0_21, %c0_22], %40 {strides = array<i32>} : memref<128x8xf32, #tpu.memory_space<vmem>>, vector<128x8xf32>,
    return
  }
  func.func @transform_0(%arg0: i32) -> (i32, i32) {
    %c0_i32 = arith.constant 0 : i32
    %c0_i32_0 = arith.constant 0 : i32
    return %arg0, %c0_i32 : i32, i32
  }
  func.func @transform_1(%arg0: i32) -> (i32, i32) {
    %c0_i32 = arith.constant 0 : i32
    %c0_i32_0 = arith.constant 0 : i32
    return %arg0, %c0_i32 : i32, i32
  }
  func.func @transform_2(%arg0: i32) -> (i32, i32) {
    %c0_i32 = arith.constant 0 : i32
    %c0_i32_0 = arith.constant 0 : i32
    %c0_i32_1 = arith.constant 0 : i32
    return %c0_i32, %c0_i32_0 : i32, i32
  }
  func.func @transform_3(%arg0: i32) -> (i32, i32) {
    %c0_i32 = arith.constant 0 : i32
    %c0_i32_0 = arith.constant 0 : i32
    %c0_i32_1 = arith.constant 0 : i32
    return %c0_i32, %c0_i32_0 : i32, i32
  }
  func.func @transform_4(%arg0: i32) -> (i32, i32) {
    %c0_i32 = arith.constant 0 : i32
    %c0_i32_0 = arith.constant 0 : i32
    %c0_i32_1 = arith.constant 0 : i32
    return %c0_i32, %c0_i32_0 : i32, i32
  }
  func.func @transform_5(%arg0: i32) -> (i32, i32) {
    %c0_i32 = arith.constant 0 : i32
    %c0_i32_0 = arith.constant 0 : i32
    %c0_i32_1 = arith.constant 0 : i32
    return %c0_i32, %c0_i32_0 : i32, i32
  }
  func.func @transform_6(%arg0: i32) -> (i32, i32) {
    %c0_i32 = arith.constant 0 : i32
    %c0_i32_0 = arith.constant 0 : i32
    return %arg0, %c0_i32 : i32, i32
  }
  func.func @transform_7(%arg0: i32) -> (i32, i32) {
    %c0_i32 = arith.constant 0 : i32
    %c0_i32_0 = arith.constant 0 : i32
    return %arg0, %c0_i32 : i32, i32
  }
}

module attributes {stable_mosaic.version = 11 : i64} {
  func.func @gcn_lpa_level_kernel(%arg0: i32, %arg1: memref<128x128xbf16, #tpu.memory_space<vmem>>, %arg2: memref<128x1xf32, #tpu.memory_space<vmem>>, %arg3: memref<128x32xbf16, #tpu.memory_space<vmem>>, %arg4: memref<32x32xbf16, #tpu.memory_space<vmem>>, %arg5: memref<1x32xf32, #tpu.memory_space<vmem>>, %arg6: memref<128x8xbf16, #tpu.memory_space<vmem>>, %arg7: memref<128x32xbf16, #tpu.memory_space<vmem>>, %arg8: memref<128x8xbf16, #tpu.memory_space<vmem>>) attributes {dimension_semantics = [#tpu.dimension_semantics<parallel>], iteration_bounds = array<i64: 1>, scalar_prefetch = 0 : i64, scratch_operands = 0 : i64, tpu.core_type = #tpu.core_type<tc>, window_params = [{transform_indices = @transform_0, window_bounds = array<i64: 128, 128>}, {transform_indices = @transform_1, window_bounds = array<i64: 128, 1>}, {pipeline_mode = #tpu.pipeline_mode<synchronous>, transform_indices = @transform_2, window_bounds = array<i64: 128, 32>}, {pipeline_mode = #tpu.pipeline_mode<synchronous>, transform_indices = @transform_3, window_bounds = array<i64: 32, 32>}, {pipeline_mode = #tpu.pipeline_mode<synchronous>, transform_indices = @transform_4, window_bounds = array<i64: 1, 32>}, {pipeline_mode = #tpu.pipeline_mode<synchronous>, transform_indices = @transform_5, window_bounds = array<i64: 128, 8>}, {transform_indices = @transform_6, window_bounds = array<i64: 128, 32>}, {transform_indices = @transform_7, window_bounds = array<i64: 128, 8>}]} {
    %c0 = arith.constant 0 : index
    %c0_0 = arith.constant 0 : index
    %0 = vector.load %arg3[%c0, %c0_0] : memref<128x32xbf16, #tpu.memory_space<vmem>>, vector<128x32xbf16>
    %c0_1 = arith.constant 0 : index
    %c0_2 = arith.constant 0 : index
    %1 = vector.load %arg4[%c0_1, %c0_2] : memref<32x32xbf16, #tpu.memory_space<vmem>>, vector<32x32xbf16>
    %cst = arith.constant dense<0.000000e+00> : vector<128x32xf32>
    %2 = tpu.matmul %0, %1, %cst {dimension_numbers = #tpu.dot_dimension_numbers<[1], [0], [0], [1], [0, 0, 1, 1], [], []>} : vector<128x32xbf16>, vector<32x32xbf16>, vector<128x32xf32> -> vector<128x32xf32>
    %c0_3 = arith.constant 0 : index
    %c0_4 = arith.constant 0 : index
    %3 = vector.load %arg1[%c0_3, %c0_4] : memref<128x128xbf16, #tpu.memory_space<vmem>>, vector<128x128xbf16>
    %4 = arith.truncf %2 : vector<128x32xf32> to vector<128x32xbf16>
    %cst_5 = arith.constant dense<0.000000e+00> : vector<128x32xf32>
    %5 = tpu.matmul %3, %4, %cst_5 {dimension_numbers = #tpu.dot_dimension_numbers<[1], [0], [0], [1], [0, 0, 1, 1], [], []>} : vector<128x128xbf16>, vector<128x32xbf16>, vector<128x32xf32> -> vector<128x32xf32>
    %c0_6 = arith.constant 0 : index
    %c0_7 = arith.constant 0 : index
    %6 = vector.load %arg6[%c0_6, %c0_7] : memref<128x8xbf16, #tpu.memory_space<vmem>>, vector<128x8xbf16>
    %cst_8 = arith.constant dense<0.000000e+00> : vector<128x8xf32>
    %7 = tpu.matmul %3, %6, %cst_8 {dimension_numbers = #tpu.dot_dimension_numbers<[1], [0], [0], [1], [0, 0, 1, 1], [], []>} : vector<128x128xbf16>, vector<128x8xbf16>, vector<128x8xf32> -> vector<128x8xf32>
    %c0_9 = arith.constant 0 : index
    %c0_10 = arith.constant 0 : index
    %8 = vector.load %arg2[%c0_9, %c0_10] : memref<128x1xf32, #tpu.memory_space<vmem>>, vector<128x1xf32>
    %cst_11 = arith.constant 0.000000e+00 : f32
    %9 = vector.broadcast %cst_11 : f32 to vector<128x1xf32>
    %10 = arith.cmpf oeq, %8, %9 : vector<128x1xf32>
    %11 = tpu.reciprocal %8 {approx = true} : vector<128x1xf32> -> vector<128x1xf32>
    %cst_12 = arith.constant 0.000000e+00 : f32
    %12 = vector.broadcast %cst_12 : f32 to vector<128x1xf32>
    %13 = arith.select %10, %12, %11 : vector<128x1xi1>, vector<128x1xf32>
    %14 = vector.broadcast %13 : vector<128x1xf32> to vector<128x32xf32>
    %15 = arith.mulf %5, %14 : vector<128x32xf32>
    %c0_13 = arith.constant 0 : index
    %c0_14 = arith.constant 0 : index
    %16 = vector.load %arg5[%c0_13, %c0_14] : memref<1x32xf32, #tpu.memory_space<vmem>>, vector<1x32xf32>
    %17 = vector.broadcast %16 : vector<1x32xf32> to vector<128x32xf32>
    %18 = arith.addf %15, %17 : vector<128x32xf32>
    %19 = vector.broadcast %13 : vector<128x1xf32> to vector<128x8xf32>
    %20 = arith.mulf %7, %19 : vector<128x8xf32>
    %cst_15 = arith.constant 0.000000e+00 : f32
    %21 = vector.broadcast %cst_15 : f32 to vector<128x32xf32>
    %22 = arith.maximumf %18, %21 : vector<128x32xf32>
    %23 = arith.truncf %22 : vector<128x32xf32> to vector<128x32xbf16>
    %c0_16 = arith.constant 0 : index
    %c0_17 = arith.constant 0 : index
    %24 = vector.load %arg7[%c0_16, %c0_17] : memref<128x32xbf16, #tpu.memory_space<vmem>>, vector<128x32xbf16>
    tpu.vector_store %arg7[%c0_16, %c0_17], %23 {strides = array<i32>} : memref<128x32xbf16, #tpu.memory_space<vmem>>, vector<128x32xbf16>,
    %25 = arith.truncf %20 : vector<128x8xf32> to vector<128x8xbf16>
    %c0_18 = arith.constant 0 : index
    %c0_19 = arith.constant 0 : index
    %26 = vector.load %arg8[%c0_18, %c0_19] : memref<128x8xbf16, #tpu.memory_space<vmem>>, vector<128x8xbf16>
    tpu.vector_store %arg8[%c0_18, %c0_19], %25 {strides = array<i32>} : memref<128x8xbf16, #tpu.memory_space<vmem>>, vector<128x8xbf16>,
    return
  }
  func.func @transform_0(%arg0: i32) -> (i32, i32) {
    %c0_i32 = arith.constant 0 : i32
    %c0_i32_0 = arith.constant 0 : i32
    return %arg0, %c0_i32 : i32, i32
  }
  func.func @transform_1(%arg0: i32) -> (i32, i32) {
    %c0_i32 = arith.constant 0 : i32
    %c0_i32_0 = arith.constant 0 : i32
    return %arg0, %c0_i32 : i32, i32
  }
  func.func @transform_2(%arg0: i32) -> (i32, i32) {
    %c0_i32 = arith.constant 0 : i32
    %c0_i32_0 = arith.constant 0 : i32
    %c0_i32_1 = arith.constant 0 : i32
    return %c0_i32, %c0_i32_0 : i32, i32
  }
  func.func @transform_3(%arg0: i32) -> (i32, i32) {
    %c0_i32 = arith.constant 0 : i32
    %c0_i32_0 = arith.constant 0 : i32
    %c0_i32_1 = arith.constant 0 : i32
    return %c0_i32, %c0_i32_0 : i32, i32
  }
  func.func @transform_4(%arg0: i32) -> (i32, i32) {
    %c0_i32 = arith.constant 0 : i32
    %c0_i32_0 = arith.constant 0 : i32
    %c0_i32_1 = arith.constant 0 : i32
    return %c0_i32, %c0_i32_0 : i32, i32
  }
  func.func @transform_5(%arg0: i32) -> (i32, i32) {
    %c0_i32 = arith.constant 0 : i32
    %c0_i32_0 = arith.constant 0 : i32
    %c0_i32_1 = arith.constant 0 : i32
    return %c0_i32, %c0_i32_0 : i32, i32
  }
  func.func @transform_6(%arg0: i32) -> (i32, i32) {
    %c0_i32 = arith.constant 0 : i32
    %c0_i32_0 = arith.constant 0 : i32
    return %arg0, %c0_i32 : i32, i32
  }
  func.func @transform_7(%arg0: i32) -> (i32, i32) {
    %c0_i32 = arith.constant 0 : i32
    %c0_i32_0 = arith.constant 0 : i32
    return %arg0, %c0_i32 : i32, i32
  }
}

</mosaic_0001>

<bundles_post_ra>
// kernel: net_forward.3
= control target key start
LH: loop header
LB: loop body
LE: loop exit
PB: predicated region body
PF: predicated region fallthrough
CT: control target
= control target key end

     0   :  { %13 = vsyncpa [#allocation3], 0  ;;  %s1848_s0 = inlined_call_operand.hbm [shape: bf16[128,128], index: 0, kind: input, shape index: {}]   ;;  %s1849_s1 = inlined_call_operand.hbm [shape: f32[128,1], index: 1, kind: input, shape index: {}]   ;;  %s1850_s2 = inlined_call_operand.hbm [shape: bf16[128,32], index: 2, kind: input, shape index: {}]   ;;  %s1851_s3 = inlined_call_operand.hbm [shape: bf16[32,32], index: 3, kind: input, shape index: {}]   ;;  %s1852_s4 = inlined_call_operand.hbm [shape: f32[1,32], index: 4, kind: input, shape index: {}]   ;;  %s1853_s5 = inlined_call_operand.hbm [shape: bf16[128,8], index: 5, kind: input, shape index: {}]   ;;  %s1854_s6 = inlined_call_operand.hbm [shape: bf16[128,32], index: 6, kind: output, shape index: {0}]   ;;  %s1855_s7 = inlined_call_operand.hbm [shape: bf16[128,8], index: 7, kind: output, shape index: {1}]  }
   0x1   :  { %14 = vsyncpa [#allocation6], 0 }
   0x2   :  { %15 = vsyncpa [#allocation9], 0 }
   0x3   :  { %16 = vsyncpa [#allocation12], 0 }
   0x4   :  { %17 = vsyncpa [#allocation4], 0 }
   0x5   :  { %18 = vsyncpa [#allocation15], 0  ;;  %s1531_s24 = smov [#allocation5]   ;;  %s1343_s28 = scalar_lea.hbm %s1849_s1, 2048 }
   0x6   :  { %s36_s25 = sshll.u32 %s1531_s24, 4  ;;  %p1344_p0 = scmp.ne.s32.totalorder %s1849_s1, %s1343_s28  ;;  %s37_s25 = int_to_ptr.vmem [resolvable:$true] %s36_s25 }
   0x7   :  { %p1347_p1 = scmp.lt.u32.totalorder %s1343_s28, %s1849_s1 }
   0x9   :  { %p1349_p2 = pnand %p1347_p1, %p1344_p0 }
   0xb   :  { %1352 = shalt.err (!%p1349_p2)
}
   0xc   :  { %s1353_s10 = scalar_lea.vmem %s37_s25, 2048  ;;  %p1358_p4 = scmp.lt.s32.totalorder %s37_s25, %s37_s25 }
   0xd   :  { %p1354_p3 = scmp.ne.s32.totalorder %s37_s25, %s1353_s10  ;;  %p1359_p5 = scmp.lt.s32.totalorder %s1353_s10, %s1353_s10 }
   0xf   :  { %p1360_p6 = por %p1359_p5, %p1358_p4 }
  0x11   :  { %p1361_p7 = pnand %p1360_p6, %p1354_p3 }
  0x13   :  { %1364 = shalt.err (!%p1361_p7)
}
  0x14   :  { %s1532_s11 = smov 128   ;;  %s1533_s12 = smov 8  }
  0x15   :  { %42 = dma.hbm_to_vmem [thread:$0]  %s1849_s1, 2048, %s37_s25, [#allocation6], %s1532_s11, %s1532_s11, %s1533_s12  }
  0x16   :  { %s1534_s15 = smov [#allocation8]   ;;  %s1535_s17 = smov [#allocation2]  }
  0x17   :  { %s60_s16 = sshll.u32 %s1534_s15, 4  ;;  %s24_s18 = sshll.u32 %s1535_s17, 4  ;;  %s61_s16 = int_to_ptr.vmem [resolvable:$true] %s60_s16  ;;  %s25_s18 = int_to_ptr.vmem [resolvable:$true] %s24_s18 }
  0x18   :  { %s1365_s21 = scalar_lea.hbm %s1851_s3, 256 }
  0x19   :  { %p1366_p8 = scmp.ne.s32.totalorder %s1851_s3, %s1365_s21  ;;  %p1369_p9 = scmp.lt.u32.totalorder %s1365_s21, %s1851_s3 }
  0x1b   :  { %p1371_p10 = pnand %p1369_p9, %p1366_p8 }
  0x1d   :  { %1374 = shalt.err (!%p1371_p10)
}
  0x1e   :  { %s1375_s1 = scalar_lea.vmem %s61_s16, 256  ;;  %p1380_p12 = scmp.lt.s32.totalorder %s61_s16, %s61_s16 }
  0x1f   :  { %p1376_p11 = scmp.ne.s32.totalorder %s61_s16, %s1375_s1  ;;  %p1381_p13 = scmp.lt.s32.totalorder %s1375_s1, %s1375_s1 }
  0x21   :  { %p1382_p0 = por %p1381_p13, %p1380_p12 }
  0x23   :  { %p1383_p1 = pnand %p1382_p0, %p1376_p11 }
  0x25   :  { %1386 = shalt.err (!%p1383_p1)
}
  0x26   :  { %s1536_s25 = smov 64   ;;  %s1537_s27 = smov 4  }
  0x27   :  { %66 = dma.hbm_to_vmem [thread:$0]  %s1851_s3, 256, %s61_s16, [#allocation9], %s1536_s25, %s1536_s25, %s1537_s27  }
  0x28   :  { %s1387_s9 = scalar_lea.hbm %s1848_s0, 1024 }
  0x29   :  { %p1388_p2 = scmp.ne.s32.totalorder %s1848_s0, %s1387_s9  ;;  %p1391_p3 = scmp.lt.u32.totalorder %s1387_s9, %s1848_s0 }
  0x2b   :  { %p1393_p4 = pnand %p1391_p3, %p1388_p2 }
  0x2d   :  { %1396 = shalt.err (!%p1393_p4)
}
  0x2e   :  { %s1397_s14 = scalar_lea.vmem %s25_s18, 1024  ;;  %p1402_p6 = scmp.lt.s32.totalorder %s25_s18, %s25_s18 }
  0x2f   :  { %p1398_p5 = scmp.ne.s32.totalorder %s25_s18, %s1397_s14  ;;  %p1403_p7 = scmp.lt.s32.totalorder %s1397_s14, %s1397_s14 }
  0x31   :  { %p1404_p8 = por %p1403_p7, %p1402_p6 }
  0x33   :  { %p1405_p9 = pnand %p1404_p8, %p1398_p5 }
  0x35   :  { %1408 = shalt.err (!%p1405_p9)
}
  0x36   :  { %30 = dma.hbm_to_vmem [thread:$0]  %s1848_s0, 1024, %s25_s18, [#allocation3], %s1536_s25, %s1536_s25, %s1537_s27  }
  0x37   :  { %s1538_s16 = smov [#allocation7]   ;;  %s1539_s19 = smov [#allocation10]  }
  0x38   :  { %s48_s17 = sshll.u32 %s1538_s16, 4  ;;  %s73_s20 = sshll.u32 %s1539_s19, 4  ;;  %s49_s17 = int_to_ptr.vmem [resolvable:$true] %s48_s17  ;;  %s74_s20 = int_to_ptr.vmem [resolvable:$true] %s73_s20 }
  0x39   :  { %s1409_s23 = scalar_lea.hbm %s1850_s2, 1024 }
  0x3a   :  { %p1410_p10 = scmp.ne.s32.totalorder %s1850_s2, %s1409_s23  ;;  %p1413_p11 = scmp.lt.u32.totalorder %s1409_s23, %s1850_s2 }
  0x3c   :  { %p1415_p12 = pnand %p1413_p11, %p1410_p10 }
  0x3e   :  { %1418 = shalt.err (!%p1415_p12)
}
  0x3f   :  { %s1419_s0 = scalar_lea.vmem %s49_s17, 1024  ;;  %p1424_p0 = scmp.lt.s32.totalorder %s49_s17, %s49_s17 }
  0x40   :  { %p1420_p13 = scmp.ne.s32.totalorder %s49_s17, %s1419_s0  ;;  %p1425_p1 = scmp.lt.s32.totalorder %s1419_s0, %s1419_s0 }
  0x42   :  { %p1426_p2 = por %p1425_p1, %p1424_p0 }
  0x44   :  { %p1427_p3 = pnand %p1426_p2, %p1420_p13 }
  0x46   :  { %1430 = shalt.err (!%p1427_p3)
}
  0x47   :  { %54 = dma.hbm_to_vmem [thread:$0]  %s1850_s2, 1024, %s49_s17, [#allocation6], %s1536_s25, %s1536_s25, %s1537_s27  }
  0x48   :  { %s1431_s9 = scalar_lea.hbm %s1852_s4, 16 }
  0x49   :  { %p1432_p4 = scmp.ne.s32.totalorder %s1852_s4, %s1431_s9  ;;  %p1435_p5 = scmp.lt.u32.totalorder %s1431_s9, %s1852_s4 }
  0x4b   :  { %p1437_p6 = pnand %p1435_p5, %p1432_p4 }
  0x4d   :  { %1440 = shalt.err (!%p1437_p6)
}
  0x4e   :  { %s1441_s14 = scalar_lea.vmem %s74_s20, 16  ;;  %s1445_s3 = scalar_lea.vmem %s74_s20, 32 }
  0x4f   :  { %p1442_p7 = scmp.ne.s32.totalorder %s74_s20, %s1441_s14  ;;  %p1446_p8 = scmp.lt.s32.totalorder %s74_s20, %s74_s20 }
  0x50   :  { %p1447_p9 = scmp.lt.s32.totalorder %s1445_s3, %s1441_s14 }
  0x52   :  { %p1448_p10 = por %p1447_p9, %p1446_p8 }
  0x54   :  { %p1449_p11 = pnand %p1448_p10, %p1442_p7 }
  0x56   :  { %1452 = shalt.err (!%p1449_p11)
}
  0x57   :  { %76 = dma.hbm_to_vmem [thread:$0]  %s1852_s4, 16, %s74_s20, [#allocation9]  }
  0x58   :  { %s1540_s16 = smov [#allocation11]   ;;  %s1453_s22 = scalar_lea.hbm %s1853_s5, 1024 }
  0x59   :  { %s82_s17 = sshll.u32 %s1540_s16, 4  ;;  %p1454_p12 = scmp.ne.s32.totalorder %s1853_s5, %s1453_s22  ;;  %s83_s17 = int_to_ptr.vmem [resolvable:$true] %s82_s17 }
  0x5a   :  { %p1457_p13 = scmp.lt.u32.totalorder %s1453_s22, %s1853_s5 }
  0x5c   :  { %p1459_p0 = pnand %p1457_p13, %p1454_p12 }
  0x5e   :  { %1462 = shalt.err (!%p1459_p0)
}
  0x5f   :  { %s1463_s28 = scalar_lea.vmem %s83_s17, 1024  ;;  %p1468_p2 = scmp.lt.s32.totalorder %s83_s17, %s83_s17 }
  0x60   :  { %p1464_p1 = scmp.ne.s32.totalorder %s83_s17, %s1463_s28  ;;  %p1469_p3 = scmp.lt.s32.totalorder %s1463_s28, %s1463_s28 }
  0x62   :  { %p1470_p4 = por %p1469_p3, %p1468_p2 }
  0x64   :  { %p1471_p5 = pnand %p1470_p4, %p1464_p1 }
  0x66   :  { %1474 = shalt.err (!%p1471_p5)
}
  0x67   :  { %88 = dma.hbm_to_vmem [thread:$0]  %s1853_s5, 1024, %s83_s17, [#allocation12], %s1536_s25, %s1536_s25, %s1537_s27  }
  0x68   :  { %1519 = dma.done.wait [#allocation3], 1024  }
  0x69   :  { %1520 = vsyncadd [#allocation3], 4294966272 }
  0x6a   :  { %1521 = dma.done.wait [#allocation6], 3072  }
  0x6b   :  { %1522 = vsyncadd [#allocation6], 4294964224 }
  0x6c   :  { %1523 = dma.done.wait [#allocation9], 272  }
  0x6d   :  { %1524 = vsyncadd [#allocation9], 4294967024 }
  0x6e   :  { %1525 = dma.done.wait [#allocation12], 1024  }
  0x6f   :  { %1526 = vsyncadd [#allocation12], 4294966272  ;;  %v1285_v0 = vld [vmem:[#allocation8] sm:$0xff]   ;;  %v1286_v1 = vld [vmem:[#allocation8 + $0x8] sm:$0xff]   ;;  %vm180_vm0 = vcmask 261120   ;;  %v1541_v29 = vmov 0  }
  0x70   :  { %1186 = vmatprep.subr.bf16.mxu0 %v1285_v0  ;;  %v1287_v2 = vld [vmem:[#allocation7] sm:$0xff]   ;;  %v1288_v3 = vld [vmem:[#allocation7 + $0x8] sm:$0xff]   ;;  %v1289_v4 = vld [vmem:[#allocation7 + $0x10] sm:$0xff]   ;;  %1284 = vset.pattern.permute.xlu1 %v1541_v29  ;;  %s1542_s5 = smov [#allocation14]  }
  0x71   :  { %1187 = vmatpush3.bf16.msra.mxu0 %v1285_v0  ;;  %1190 = vmatprep.mubr.msk.bf16.mxu0 %vm180_vm0, %v1287_v2  ;;  %v1295_v5 = vld [vmem:[#allocation11] sm:$0xff]   ;;  %v1296_v6 = vld [vmem:[#allocation11 + $0x8] sm:$0xff]   ;;  %v1297_v8 = vld [vmem:[#allocation11 + $0x10] sm:$0xff]   ;;  %s1026_s0 = sshll.u32 %s1542_s5, 4  ;;  %s1027_s0 = int_to_ptr.vmem [resolvable:$true] %s1026_s0 }
  0x72   :  { %1188 = vmatprep.subr.bf16.mxu0 %v1286_v1  ;;  %v1290_v7 = vld [vmem:[#allocation7 + $0x18] sm:$0xff]   ;;  %v1291_v9 = vld [vmem:[#allocation7 + $0x20] sm:$0xff]   ;;  %v1298_v10 = vld [vmem:[#allocation11 + $0x18] sm:$0xff]   ;;  %1283 = vset.pattern.permute.xlu0 %v1541_v29  ;;  %s1475_s18 = scalar_lea.vmem %s1027_s0, 1024  ;;  %p1480_p7 = scmp.lt.s32.totalorder %s1027_s0, %s1027_s0 }
  0x73   :  { %v1292_v11 = vld [vmem:[#allocation7 + $0x28] sm:$0xff]   ;;  %v1299_v12 = vld [vmem:[#allocation11 + $0x20] sm:$0xff]   ;;  %v1300_v14 = vld [vmem:[#allocation11 + $0x28] sm:$0xff]   ;;  %p1476_p6 = scmp.ne.s32.totalorder %s1027_s0, %s1475_s18  ;;  %p1481_p8 = scmp.lt.s32.totalorder %s1475_s18, %s1475_s18 }
  0x74   :  { %v1293_v13 = vld [vmem:[#allocation7 + $0x30] sm:$0xff]   ;;  %v1294_v15 = vld [vmem:[#allocation7 + $0x38] sm:$0xff]   ;;  %v1301_v16 = vld [vmem:[#allocation11 + $0x30] sm:$0xff]  }
  0x75   :  { %1189 = vmatpush3.bf16.msra.mxu0 %v1286_v1  ;;  %v1302_v17 = vld [vmem:[#allocation11 + $0x38] sm:$0xff]   ;;  %v1303_v18 = vld [vmem:[#allocation2] sm:$0xff]   ;;  %v1681_v21 = vld [vmem:[#allocation2 + $0x18] sm:$0xff]   ;;  %p1482_p9 = por %p1481_p8, %p1480_p7 }
  0x76   :  { %1238 = vmatprep.subr.bf16.mxu0 %v1295_v5  ;;  %v1676_v19 = vld [vmem:[#allocation2 + $0x8] sm:$0xff]   ;;  %1222 = vmatprep.mubr.bf16.mxu1 %v1303_v18  ;;  %v1679_v20 = vld [vmem:[#allocation2 + $0x10] sm:$0xff]   ;;  %v1685_v22 = vld [vmem:[#allocation2 + $0x20] sm:$0xff]  }
  0x77   :  { %v1687_v23 = vld [vmem:[#allocation2 + $0x28] sm:$0xff]   ;;  %v1691_v24 = vld [vmem:[#allocation2 + $0x30] sm:$0xff]   ;;  %v1693_v25 = vld [vmem:[#allocation2 + $0x38] sm:$0xff]   ;;  %p1483_p10 = pnand %p1482_p9, %p1476_p6 }
  0x78   :  { %1191 = vmatmul.mubr.msk.bf16.vlgmr.msra.gmra.mrb[0].mxu0 %vm180_vm0, %v1288_v3  ;;  %v634_v26 = vld [vmem:[#allocation5 + $0x10] sm:$0xff]  ;;  %v632_v27 = vld [vmem:[#allocation5] sm:$0xff]  ;;  %v635_v28 = vld [vmem:[#allocation5 + $0x18] sm:$0xff] }
  0x79   :  { %1194 = vmatprep.mubr.msk.bf16.mxu0 %vm180_vm0, %v1289_v4  ;;  %1239 = vmatpush3.bf16.msra.mxu0 %v1295_v5  ;;  %1311 = vrcp.f32 %v634_v26  ;;  %v633_v30 = vld [vmem:[#allocation5 + $0x8] sm:$0xff]  ;;  %v636_v32 = vld [vmem:[#allocation5 + $0x20] sm:$0xff]  ;;  %v639_v33 = vld [vmem:[#allocation5 + $0x38] sm:$0xff]  ;;  %vm650_vm1 = vcmp.eq.f32.partialorder %v634_v26, 0.0  ;;  %vm648_vm2 = vcmp.eq.f32.partialorder %v632_v27, 0.0  ;;  %vm651_vm3 = vcmp.eq.f32.partialorder %v635_v28, 0.0 }
  0x7a   :  { %1240 = vmatprep.subr.bf16.mxu0 %v1296_v6  ;;  %1313 = vrcp.f32 %v632_v27  ;;  %v637_v31 = vld [vmem:[#allocation5 + $0x28] sm:$0xff]  ;;  %v638_v34 = vld [vmem:[#allocation5 + $0x30] sm:$0xff]  ;;  %v640_v37 = vld [vmem:[#allocation5 + $0x40] sm:$0xff]  ;;  %vm649_vm4 = vcmp.eq.f32.partialorder %v633_v30, 0.0  ;;  %vm652_vm6 = vcmp.eq.f32.partialorder %v636_v32, 0.0  ;;  %vm655_vm7 = vcmp.eq.f32.partialorder %v639_v33, 0.0 }
  0x7b   :  { %1315 = vrcp.f32 %v635_v28  ;;  %v641_v35 = vld [vmem:[#allocation5 + $0x48] sm:$0xff]  ;;  %v643_v44 = vld [vmem:[#allocation5 + $0x58] sm:$0xff]  ;;  %vm653_vm5 = vcmp.eq.f32.partialorder %v637_v31, 0.0  ;;  %v642_v47 = vld [vmem:[#allocation5 + $0x50] sm:$0xff]  ;;  %vm654_vm8 = vcmp.eq.f32.partialorder %v638_v34, 0.0  ;;  %vm656_vm10 = vcmp.eq.f32.partialorder %v640_v37, 0.0 }
  0x7c   :  { %1317 = vrcp.f32 %v633_v30  ;;  %v645_v50 = vld [vmem:[#allocation5 + $0x68] sm:$0xff]  ;;  %v644_v53 = vld [vmem:[#allocation5 + $0x60] sm:$0xff]  ;;  %v647_v56 = vld [vmem:[#allocation5 + $0x78] sm:$0xff]  ;;  %vm657_vm9 = vcmp.eq.f32.partialorder %v641_v35, 0.0  ;;  %vm659_vm11 = vcmp.eq.f32.partialorder %v643_v44, 0.0  ;;  %vm658_vm12 = vcmp.eq.f32.partialorder %v642_v47, 0.0 }
  0x7d   :  { %1241 = vmatpush3.bf16.msra.mxu0 %v1296_v6  ;;  %1319 = vrcp.f32 %v637_v31  ;;  %v646_v59 = vld [vmem:[#allocation5 + $0x70] sm:$0xff]  ;;  %vm661_vm13 = vcmp.eq.f32.partialorder %v645_v50, 0.0  ;;  %vm660_vm14 = vcmp.eq.f32.partialorder %v644_v53, 0.0  ;;  %vm663_vm15 = vcmp.eq.f32.partialorder %v647_v56, 0.0 }
  0x7e   :  { %1242 = vmatprep.subr.bf16.mxu0 %v1297_v8  ;;  %1321 = vrcp.f32 %v636_v32 }
  0x7f   :  { %1323 = vrcp.f32 %v639_v33 }
  0x80   :  { %1195 = vmatmul.mubr.msk.bf16.gmra.mrb[4].mxu0 %vm180_vm0, %v1290_v7  ;;  %1325 = vrcp.f32 %v638_v34 }
  0x81   :  { %1198 = vmatprep.mubr.msk.bf16.mxu0 %vm180_vm0, %v1291_v9  ;;  %1243 = vmatpush3.bf16.msra.mxu0 %v1297_v8  ;;  %1327 = vrcp.f32 %v641_v35 }
  0x82   :  { %1244 = vmatprep.subr.bf16.mxu0 %v1298_v10  ;;  %1329 = vrcp.f32 %v640_v37 }
  0x83   :  { %v1312_v36 = vpop.eup %1311  ;;  %1331 = vrcp.f32 %v643_v44 }
  0x84   :  { %v1314_v38 = vpop.eup %1313  ;;  %v682_v39 = vsel %vm650_vm1, 0.0, %v1312_v36  ;;  %1333 = vrcp.f32 %v642_v47  ;;  %vm992_vm1 = vcmask 60416  }
  0x85   :  { %1245 = vmatpush3.bf16.msra.mxu0 %v1298_v10  ;;  %v1316_v40 = vpop.eup %1315  ;;  %708 = vperm.xlu1 %1284, %v682_v39   ;;  %v680_v41 = vsel %vm648_vm2, 0.0, %v1314_v38  ;;  %1335 = vrcp.f32 %v645_v50 }
  0x86   :  { %1246 = vmatprep.subr.bf16.mxu0 %v1299_v12  ;;  %v1318_v42 = vpop.eup %1317  ;;  %698 = vperm.xlu0 %1283, %v680_v41   ;;  %v683_v43 = vsel %vm651_vm3, 0.0, %v1316_v40  ;;  %1337 = vrcp.f32 %v644_v53 }
  0x87   :  { %v1320_v45 = vpop.eup %1319  ;;  %v681_v46 = vsel %vm649_vm4, 0.0, %v1318_v42  ;;  %1339 = vrcp.f32 %v647_v56 }
  0x88   :  { %1199 = vmatmul.mubr.msk.bf16.gmra.mrb[8].mxu0 %vm180_vm0, %v1292_v11  ;;  %v1322_v48 = vpop.eup %1321  ;;  %v685_v49 = vsel %vm653_vm5, 0.0, %v1320_v45  ;;  %1341 = vrcp.f32 %v646_v59 }
  0x89   :  { %1202 = vmatprep.mubr.msk.bf16.mxu0 %vm180_vm0, %v1293_v13  ;;  %1247 = vmatpush3.bf16.msra.mxu0 %v1299_v12  ;;  %v1324_v51 = vpop.eup %1323  ;;  %v684_v52 = vsel %vm652_vm6, 0.0, %v1322_v48 }
  0x8a   :  { %1248 = vmatprep.subr.bf16.mxu0 %v1300_v14  ;;  %713 = vperm.xlu1 %1284, %v683_v43   ;;  %v1326_v54 = vpop.eup %1325  ;;  %v687_v55 = vsel %vm655_vm7, 0.0, %v1324_v51 }
  0x8b   :  { %703 = vperm.xlu0 %1283, %v681_v46   ;;  %v1328_v57 = vpop.eup %1327  ;;  %v686_v58 = vsel %vm654_vm8, 0.0, %v1326_v54 }
  0x8c   :  { %v1330_v60 = vpop.eup %1329  ;;  %v689_v61 = vsel %vm657_vm9, 0.0, %v1328_v57 }
  0x8d   :  { %1249 = vmatpush3.bf16.msra.mxu0 %v1300_v14  ;;  %v1332_v62 = vpop.eup %1331  ;;  %v688_v63 = vsel %vm656_vm10, 0.0, %v1330_v60 }
  0x8e   :  { %1250 = vmatprep.subr.bf16.mxu0 %v1301_v16  ;;  %723 = vperm.xlu1 %1284, %v685_v49   ;;  %v1334_v0 = vpop.eup %1333  ;;  %v691_v1 = vsel %vm659_vm11, 0.0, %v1332_v62 }
  0x8f   :  { %718 = vperm.xlu0 %1283, %v684_v52   ;;  %v1336_v2 = vpop.eup %1335  ;;  %v690_v3 = vsel %vm658_vm12, 0.0, %v1334_v0 }
  0x90   :  { %1203 = vmatmul.mubr.msk.bf16.gmra.mrb[12].mxu0 %vm180_vm0, %v1294_v15  ;;  %v1338_v4 = vpop.eup %1337  ;;  %v693_v5 = vsel %vm661_vm13, 0.0, %v1336_v2  ;;  %vm662_vm0 = vcmp.eq.f32.partialorder %v646_v59, 0.0 }
  0x91   :  { %1251 = vmatpush3.bf16.msra.mxu0 %v1301_v16  ;;  %1254 = vmatprep.mubr.bf16.mxu0 %v1303_v18  ;;  %v1340_v6 = vpop.eup %1339  ;;  %v692_v7 = vsel %vm660_vm14, 0.0, %v1338_v4 }
  0x92   :  { %1252 = vmatprep.subr.bf16.mxu0 %v1302_v17  ;;  %733 = vperm.xlu1 %1284, %v687_v55   ;;  %v1342_v8 = vpop.eup %1341  ;;  %v695_v9 = vsel %vm663_vm15, 0.0, %v1340_v6 }
  0x93   :  { %728 = vperm.xlu0 %1283, %v686_v58   ;;  %v694_v10 = vsel %vm662_vm0, 0.0, %v1342_v8 }
  0x95   :  { %1253 = vmatpush3.bf16.msra.mxu0 %v1302_v17 }
  0x96   :  { %743 = vperm.xlu1 %1284, %v689_v61  }
  0x97   :  { %738 = vperm.xlu0 %1283, %v688_v63  }
  0x98   :  { %1255 = vmatmul.mubr.bf16.vlgmr.msra.gmra.mrb[16].mxu0 %v1676_v19 }
  0x99   :  { %1258 = vmatprep.mubr.bf16.mxu0 %v1679_v20 }
  0x9a   :  { %753 = vperm.xlu1 %1284, %v691_v1  }
  0x9b   :  { %748 = vperm.xlu0 %1283, %v690_v3  }
  0x9e   :  { %763 = vperm.xlu1 %1284, %v693_v5  }
  0x9f   :  { %758 = vperm.xlu0 %1283, %v692_v7  }
  0xa0   :  { %1259 = vmatmul.mubr.bf16.gmra.mrb[20].mxu0 %v1681_v21 }
  0xa1   :  { %1262 = vmatprep.mubr.bf16.mxu0 %v1685_v22 }
  0xa2   :  { %773 = vperm.xlu1 %1284, %v695_v9  }
  0xa3   :  { %768 = vperm.xlu0 %1283, %v694_v10  }
  0xa8   :  { %1263 = vmatmul.mubr.bf16.gmra.mrb[24].mxu0 %v1687_v23 }
  0xa9   :  { %1266 = vmatprep.mubr.bf16.mxu0 %v1691_v24 }
  0xb0   :  { %1267 = vmatmul.mubr.bf16.gmra.mrb[28].mxu0 %v1693_v25 }
 0x104   :  { %v1704_v42 = vpop.permute.xlu1 %708 }
 0x105   :  { %v1706_v43 = vpop.permute.xlu0 %698 }
 0x109   :  { %v1710_v45 = vpop.permute.xlu1 %713 }
 0x10a   :  { %v1708_v44 = vpop.permute.xlu0 %703 }
 0x14b   :  { %v1192_v11 = vpop.f32.mrb[0].mxu0 }
 0x14c   :  { %v239_v12 = vpop.f32.mrb[1].mxu0 }
 0x14d   :  { %v1193_v13 = vpop.f32.mrb[2].mxu0 }
 0x14e   :  { %v319_v14 = vpack.c.bf16 %v1193_v13, %v1192_v11  ;;  %v242_v15 = vpop.f32.mrb[3].mxu0 }
 0x14f   :  { %v318_v16 = vpack.c.bf16 %v242_v15, %v239_v12 }
 0x151   :  { %1206 = vmatprep.subr.bf16.mxu1 %v318_v16 }
 0x152   :  { %1207 = vmatpush3.bf16.msra.mxu1 %v318_v16 }
 0x153   :  { %v1196_v17 = vpop.f32.mrb[4].mxu0  ;;  %1208 = vmatprep.subr.bf16.mxu1 %v319_v14 }
 0x154   :  { %v255_v18 = vpop.f32.mrb[5].mxu0 }
 0x155   :  { %v1197_v26 = vpop.f32.mrb[6].mxu0 }
 0x156   :  { %v321_v27 = vpack.c.bf16 %v1197_v26, %v1196_v17  ;;  %v258_v28 = vpop.f32.mrb[7].mxu0  ;;  %1209 = vmatpush3.bf16.msra.mxu1 %v319_v14 }
 0x157   :  { %v320_v29 = vpack.c.bf16 %v258_v28, %v255_v18 }
 0x159   :  { %1210 = vmatprep.subr.bf16.mxu1 %v320_v29 }
 0x15a   :  { %1211 = vmatpush3.bf16.msra.mxu1 %v320_v29 }
 0x15b   :  { %v1200_v30 = vpop.f32.mrb[8].mxu0  ;;  %1212 = vmatprep.subr.bf16.mxu1 %v321_v27 }
 0x15c   :  { %v271_v31 = vpop.f32.mrb[9].mxu0 }
 0x15d   :  { %v1201_v32 = vpop.f32.mrb[10].mxu0 }
 0x15e   :  { %v323_v33 = vpack.c.bf16 %v1201_v32, %v1200_v30  ;;  %v274_v34 = vpop.f32.mrb[11].mxu0  ;;  %1213 = vmatpush3.bf16.msra.mxu1 %v321_v27 }
 0x15f   :  { %v322_v35 = vpack.c.bf16 %v274_v34, %v271_v31 }
 0x161   :  { %1214 = vmatprep.subr.bf16.mxu1 %v322_v35 }
 0x162   :  { %1215 = vmatpush3.bf16.msra.mxu1 %v322_v35 }
 0x163   :  { %v1204_v36 = vpop.f32.mrb[12].mxu0  ;;  %1216 = vmatprep.subr.bf16.mxu1 %v323_v33 }
 0x164   :  { %v287_v37 = vpop.f32.mrb[13].mxu0 }
 0x165   :  { %v1205_v38 = vpop.f32.mrb[14].mxu0 }
 0x166   :  { %v325_v39 = vpack.c.bf16 %v1205_v38, %v1204_v36  ;;  %v290_v40 = vpop.f32.mrb[15].mxu0  ;;  %1217 = vmatpush3.bf16.msra.mxu1 %v323_v33 }
 0x167   :  { %v324_v41 = vpack.c.bf16 %v290_v40, %v287_v37 }
 0x169   :  { %1218 = vmatprep.subr.bf16.mxu1 %v324_v41 }
 0x16a   :  { %1219 = vmatpush3.bf16.msra.mxu1 %v324_v41 }
 0x16b   :  { %1220 = vmatprep.subr.bf16.mxu1 %v325_v39 }
 0x16e   :  { %1221 = vmatpush3.bf16.msra.mxu1 %v325_v39 }
 0x171   :  { %1223 = vmatmul.mubr.bf16.vlgmr.msra.gmra.mrb[0].mxu1 %v1676_v19  ;;  %v1712_v19 = vpop.permute.xlu0 %718 }
 0x172   :  { %1226 = vmatprep.mubr.bf16.mxu1 %v1679_v20  ;;  %v1714_v20 = vpop.permute.xlu1 %723 }
 0x179   :  { %1227 = vmatmul.mubr.bf16.gmra.mrb[4].mxu1 %v1681_v21  ;;  %v1716_v21 = vpop.permute.xlu0 %728 }
 0x17a   :  { %1230 = vmatprep.mubr.bf16.mxu1 %v1685_v22  ;;  %v1718_v22 = vpop.permute.xlu1 %733 }
 0x17d   :  { %v1723_v52 = vpop.permute.xlu0 %738 }
 0x17e   :  { %v1728_v55 = vpop.permute.xlu1 %743 }
 0x181   :  { %1231 = vmatmul.mubr.bf16.gmra.mrb[8].mxu1 %v1687_v23  ;;  %v1256_v23 = vpop.f32.mrb[16].mxu0  ;;  %v1734_v62 = vpop.permute.xlu0 %748 }
 0x182   :  { %1234 = vmatprep.mubr.bf16.mxu1 %v1691_v24  ;;  %v817_v24 = vmul.f32 %v1256_v23, %v1704_v42  ;;  %v1737_v3 = vpop.permute.xlu1 %753 }
 0x184   :  { %v1130_v48 = vpack.c.bf16 %v817_v24, %v817_v24 }
 0x185   :  { %v1744_v8 = vpop.permute.xlu0 %758 }
 0x186   :  { %995 = vst.msk [vmem:[#allocation14 + $0x8] sm:$0xf] %vm992_vm1, %v1130_v48  ;;  %v1748_v13 = vpop.permute.xlu1 %763 }
 0x189   :  { %1235 = vmatmul.mubr.bf16.gmra.mrb[12].mxu1 %v1693_v25  ;;  %v569_v25 = vpop.f32.mrb[17].mxu0  ;;  %v1754_v28 = vpop.permute.xlu0 %768 }
 0x18a   :  { %v815_v46 = vmul.f32 %v1706_v43, %v569_v25  ;;  %v1257_v47 = vpop.f32.mrb[18].mxu0  ;;  %v1758_v30 = vpop.permute.xlu1 %773 }
 0x18b   :  { %v818_v49 = vmul.f32 %v1257_v47, %v1710_v45  ;;  %v572_v50 = vpop.f32.mrb[19].mxu0 }
 0x18c   :  { %v1128_v51 = vpack.c.bf16 %v815_v46, %v815_v46  ;;  %v816_v53 = vmul.f32 %v1708_v44, %v572_v50  ;;  %v1260_v57 = vpop.f32.mrb[20].mxu0 }
 0x18d   :  { %v1131_v54 = vpack.c.bf16 %v818_v49, %v818_v49  ;;  %v821_v58 = vmul.f32 %v1260_v57, %v1716_v21  ;;  %v585_v59 = vpop.f32.mrb[21].mxu0 }
 0x18e   :  { %993 = vst.msk [vmem:[#allocation14] sm:$0xf] %vm992_vm1, %v1128_v51  ;;  %v1129_v56 = vpack.c.bf16 %v816_v53, %v816_v53  ;;  %v819_v60 = vmul.f32 %v1712_v19, %v585_v59  ;;  %v1261_v61 = vpop.f32.mrb[22].mxu0 }
 0x18f   :  { %996 = vst.msk [vmem:[#allocation14 + $0xc] sm:$0xf] %vm992_vm1, %v1131_v54  ;;  %v1134_v63 = vpack.c.bf16 %v821_v58, %v821_v58  ;;  %v822_v0 = vmul.f32 %v1261_v61, %v1718_v22  ;;  %v588_v1 = vpop.f32.mrb[23].mxu0 }
 0x190   :  { %994 = vst.msk [vmem:[#allocation14 + $0x4] sm:$0xf] %vm992_vm1, %v1129_v56  ;;  %v1132_v2 = vpack.c.bf16 %v819_v60, %v819_v60  ;;  %v820_v4 = vmul.f32 %v1714_v20, %v588_v1  ;;  %v1264_v7 = vpop.f32.mrb[24].mxu0 }
 0x191   :  { %999 = vst.msk [vmem:[#allocation14 + $0x18] sm:$0xf] %vm992_vm1, %v1134_v63  ;;  %v1135_v5 = vpack.c.bf16 %v822_v0, %v822_v0  ;;  %v825_v9 = vmul.f32 %v1264_v7, %v1734_v62  ;;  %v601_v10 = vpop.f32.mrb[25].mxu0 }
 0x192   :  { %997 = vst.msk [vmem:[#allocation14 + $0x10] sm:$0xf] %vm992_vm1, %v1132_v2  ;;  %v1133_v6 = vpack.c.bf16 %v820_v4, %v820_v4  ;;  %v823_v11 = vmul.f32 %v1723_v52, %v601_v10  ;;  %v1265_v12 = vpop.f32.mrb[26].mxu0 }
 0x193   :  { %1000 = vst.msk [vmem:[#allocation14 + $0x1c] sm:$0xf] %vm992_vm1, %v1135_v5  ;;  %v1138_v14 = vpack.c.bf16 %v825_v9, %v825_v9  ;;  %v826_v15 = vmul.f32 %v1265_v12, %v1737_v3  ;;  %v604_v16 = vpop.f32.mrb[27].mxu0 }
 0x194   :  { %998 = vst.msk [vmem:[#allocation14 + $0x14] sm:$0xf] %vm992_vm1, %v1133_v6  ;;  %v1136_v17 = vpack.c.bf16 %v823_v11, %v823_v11  ;;  %v824_v18 = vmul.f32 %v1728_v55, %v604_v16  ;;  %v1268_v29 = vpop.f32.mrb[28].mxu0 }
 0x195   :  { %1003 = vst.msk [vmem:[#allocation14 + $0x28] sm:$0xf] %vm992_vm1, %v1138_v14  ;;  %v1139_v26 = vpack.c.bf16 %v826_v15, %v826_v15  ;;  %v617_v31 = vpop.f32.mrb[29].mxu0  ;;  %v829_v32 = vmul.f32 %v1268_v29, %v1754_v28 }
 0x196   :  { %1001 = vst.msk [vmem:[#allocation14 + $0x20] sm:$0xf] %vm992_vm1, %v1136_v17  ;;  %v1137_v27 = vpack.c.bf16 %v824_v18, %v824_v18  ;;  %v827_v33 = vmul.f32 %v1744_v8, %v617_v31  ;;  %v1269_v34 = vpop.f32.mrb[30].mxu0 }
 0x197   :  { %1004 = vst.msk [vmem:[#allocation14 + $0x2c] sm:$0xf] %vm992_vm1, %v1139_v26  ;;  %v830_v35 = vmul.f32 %v1269_v34, %v1758_v30  ;;  %v1142_v36 = vpack.c.bf16 %v829_v32, %v829_v32  ;;  %v620_v37 = vpop.f32.mrb[31].mxu0 }
 0x198   :  { %1002 = vst.msk [vmem:[#allocation14 + $0x24] sm:$0xf] %vm992_vm1, %v1137_v27  ;;  %v1140_v38 = vpack.c.bf16 %v827_v33, %v827_v33  ;;  %v828_v39 = vmul.f32 %v1748_v13, %v620_v37 }
 0x199   :  { %v1143_v40 = vpack.c.bf16 %v830_v35, %v830_v35  ;;  %1007 = vst.msk [vmem:[#allocation14 + $0x38] sm:$0xf] %vm992_vm1, %v1142_v36 }
 0x19a   :  { %1005 = vst.msk [vmem:[#allocation14 + $0x30] sm:$0xf] %vm992_vm1, %v1140_v38  ;;  %v1141_v41 = vpack.c.bf16 %v828_v39, %v828_v39 }
 0x19b   :  { %1008 = vst.msk [vmem:[#allocation14 + $0x3c] sm:$0xf] %vm992_vm1, %v1143_v40 }
 0x19c   :  { %1006 = vst.msk [vmem:[#allocation14 + $0x34] sm:$0xf] %vm992_vm1, %v1141_v41 }
 0x19d   :  { %1486 = shalt.err (!%p1483_p10)
}
 0x19e   :  { %s1487_s8 = scalar_lea.hbm %s1855_s7, 1024 }
 0x19f   :  { %p1488_p11 = scmp.ne.s32.totalorder %s1855_s7, %s1487_s8  ;;  %p1491_p12 = scmp.lt.u32.totalorder %s1487_s8, %s1855_s7 }
 0x1a1   :  { %p1493_p13 = pnand %p1491_p12, %p1488_p11 }
 0x1a3   :  { %1496 = shalt.err (!%p1493_p13)
}
 0x1a4   :  { %1032 = dma.vmem_to_hbm [thread:$0]  %s1027_s0, 1024, %s1855_s7, [#allocation15], %s1536_s25, %s1536_s25, %s1537_s27   ;;  %v1783_v24 = vld [vmem:[#allocation10] ss:$0 sm:$0xff]  ;;  %vm911_vm2 = vcmask 257024  }
 0x1a5   :  { %s1543_s7 = smov [#allocation13]  }
 0x1a6   :  { %s1014_s3 = sshll.u32 %s1543_s7, 4  ;;  %s1015_s3 = int_to_ptr.vmem [resolvable:$true] %s1014_s3 }
 0x1a7   :  { %s1497_s2 = scalar_lea.vmem %s1015_s3, 1024  ;;  %p1502_p1 = scmp.lt.s32.totalorder %s1015_s3, %s1015_s3 }
 0x1a8   :  { %p1498_p0 = scmp.ne.s32.totalorder %s1015_s3, %s1497_s2  ;;  %p1503_p2 = scmp.lt.s32.totalorder %s1497_s2, %s1497_s2 }
 0x1aa   :  { %p1504_p3 = por %p1503_p2, %p1502_p1 }
 0x1ac   :  { %p1505_p4 = pnand %p1504_p3, %p1498_p0 }
 0x244   :  { %v1224_v23 = vpop.f32.mrb[0].mxu1 }
 0x245   :  { %v778_v25 = vmul.f32 %v1224_v23, %v1704_v42  ;;  %v408_v46 = vpop.f32.mrb[1].mxu1 }
 0x246   :  { %v776_v47 = vmul.f32 %v1706_v43, %v408_v46  ;;  %v1225_v48 = vpop.f32.mrb[2].mxu1 }
 0x247   :  { %v801_v49 = vadd.f32 %v1783_v24, %v778_v25  ;;  %v779_v50 = vmul.f32 %v1225_v48, %v1710_v45  ;;  %v411_v51 = vpop.f32.mrb[3].mxu1 }
 0x248   :  { %v799_v53 = vadd.f32 %v1783_v24, %v776_v47  ;;  %v777_v54 = vmul.f32 %v1708_v44, %v411_v51 }
 0x249   :  { %v833_v56 = vmax.f32 %v801_v49, 0.0  ;;  %v802_v57 = vadd.f32 %v1783_v24, %v779_v50 }
 0x24a   :  { %v831_v58 = vmax.f32 %v799_v53, 0.0  ;;  %v800_v42 = vadd.f32 %v1783_v24, %v777_v54 }
 0x24b   :  { %v1114_v59 = vpack.c.bf16 %v833_v56, %v833_v56  ;;  %v834_v60 = vmax.f32 %v802_v57, 0.0 }
 0x24c   :  { %v1112_v43 = vpack.c.bf16 %v831_v58, %v831_v58  ;;  %v832_v61 = vmax.f32 %v800_v42, 0.0  ;;  %v1228_v63 = vpop.f32.mrb[4].mxu1 }
 0x24d   :  { %914 = vst.msk [vmem:[#allocation13 + $0x8] sm:$0xf] %vm911_vm2, %v1114_v59  ;;  %v1115_v45 = vpack.c.bf16 %v834_v60, %v834_v60  ;;  %v782_v0 = vmul.f32 %v1228_v63, %v1716_v21  ;;  %v424_v1 = vpop.f32.mrb[5].mxu1 }
 0x24e   :  { %912 = vst.msk [vmem:[#allocation13] sm:$0xf] %vm911_vm2, %v1112_v43  ;;  %v1113_v44 = vpack.c.bf16 %v832_v61, %v832_v61  ;;  %v780_v2 = vmul.f32 %v1712_v19, %v424_v1  ;;  %v1229_v4 = vpop.f32.mrb[6].mxu1 }
 0x24f   :  { %915 = vst.msk [vmem:[#allocation13 + $0xc] sm:$0xf] %vm911_vm2, %v1115_v45  ;;  %v805_v5 = vadd.f32 %v1783_v24, %v782_v0  ;;  %v783_v6 = vmul.f32 %v1229_v4, %v1718_v22  ;;  %v427_v7 = vpop.f32.mrb[7].mxu1 }
 0x250   :  { %913 = vst.msk [vmem:[#allocation13 + $0x4] sm:$0xf] %vm911_vm2, %v1113_v44  ;;  %v803_v9 = vadd.f32 %v1783_v24, %v780_v2  ;;  %v781_v21 = vmul.f32 %v1714_v20, %v427_v7 }
 0x251   :  { %v837_v10 = vmax.f32 %v805_v5, 0.0  ;;  %v806_v11 = vadd.f32 %v1783_v24, %v783_v6 }
 0x252   :  { %v835_v12 = vmax.f32 %v803_v9, 0.0  ;;  %v804_v19 = vadd.f32 %v1783_v24, %v781_v21 }
 0x253   :  { %v1118_v14 = vpack.c.bf16 %v837_v10, %v837_v10  ;;  %v838_v15 = vmax.f32 %v806_v11, 0.0 }
 0x254   :  { %v1116_v16 = vpack.c.bf16 %v835_v12, %v835_v12  ;;  %v836_v17 = vmax.f32 %v804_v19, 0.0  ;;  %v1232_v18 = vpop.f32.mrb[8].mxu1 }
 0x255   :  { %918 = vst.msk [vmem:[#allocation13 + $0x18] sm:$0xf] %vm911_vm2, %v1118_v14  ;;  %v1119_v22 = vpack.c.bf16 %v838_v15, %v838_v15  ;;  %v786_v26 = vmul.f32 %v1232_v18, %v1734_v62  ;;  %v440_v27 = vpop.f32.mrb[9].mxu1 }
 0x256   :  { %916 = vst.msk [vmem:[#allocation13 + $0x10] sm:$0xf] %vm911_vm2, %v1116_v16  ;;  %v1117_v20 = vpack.c.bf16 %v836_v17, %v836_v17  ;;  %v784_v29 = vmul.f32 %v1723_v52, %v440_v27  ;;  %v1233_v31 = vpop.f32.mrb[10].mxu1 }
 0x257   :  { %919 = vst.msk [vmem:[#allocation13 + $0x1c] sm:$0xf] %vm911_vm2, %v1119_v22  ;;  %v809_v32 = vadd.f32 %v1783_v24, %v786_v26  ;;  %v787_v33 = vmul.f32 %v1233_v31, %v1737_v3  ;;  %v443_v34 = vpop.f32.mrb[11].mxu1 }
 0x258   :  { %917 = vst.msk [vmem:[#allocation13 + $0x14] sm:$0xf] %vm911_vm2, %v1117_v20  ;;  %v807_v35 = vadd.f32 %v1783_v24, %v784_v29  ;;  %v785_v62 = vmul.f32 %v1728_v55, %v443_v34 }
 0x259   :  { %v841_v36 = vmax.f32 %v809_v32, 0.0  ;;  %v810_v37 = vadd.f32 %v1783_v24, %v787_v33 }
 0x25a   :  { %v839_v38 = vmax.f32 %v807_v35, 0.0  ;;  %v808_v52 = vadd.f32 %v1783_v24, %v785_v62 }
 0x25b   :  { %v1122_v39 = vpack.c.bf16 %v841_v36, %v841_v36  ;;  %v842_v40 = vmax.f32 %v810_v37, 0.0 }
 0x25c   :  { %v1120_v41 = vpack.c.bf16 %v839_v38, %v839_v38  ;;  %v840_v23 = vmax.f32 %v808_v52, 0.0  ;;  %v1236_v25 = vpop.f32.mrb[12].mxu1 }
 0x25d   :  { %922 = vst.msk [vmem:[#allocation13 + $0x28] sm:$0xf] %vm911_vm2, %v1122_v39  ;;  %v1123_v3 = vpack.c.bf16 %v842_v40, %v842_v40  ;;  %v790_v46 = vmul.f32 %v1236_v25, %v1754_v28  ;;  %v456_v47 = vpop.f32.mrb[13].mxu1 }
 0x25e   :  { %920 = vst.msk [vmem:[#allocation13 + $0x20] sm:$0xf] %vm911_vm2, %v1120_v41  ;;  %v1121_v55 = vpack.c.bf16 %v840_v23, %v840_v23  ;;  %v788_v48 = vmul.f32 %v1744_v8, %v456_v47  ;;  %v1237_v49 = vpop.f32.mrb[14].mxu1 }
 0x25f   :  { %923 = vst.msk [vmem:[#allocation13 + $0x2c] sm:$0xf] %vm911_vm2, %v1123_v3  ;;  %v813_v50 = vadd.f32 %v1783_v24, %v790_v46  ;;  %v791_v51 = vmul.f32 %v1237_v49, %v1758_v30  ;;  %v459_v53 = vpop.f32.mrb[15].mxu1 }
 0x260   :  { %921 = vst.msk [vmem:[#allocation13 + $0x24] sm:$0xf] %vm911_vm2, %v1121_v55  ;;  %v811_v54 = vadd.f32 %v1783_v24, %v788_v48  ;;  %v789_v28 = vmul.f32 %v1748_v13, %v459_v53 }
 0x261   :  { %v845_v56 = vmax.f32 %v813_v50, 0.0  ;;  %v814_v57 = vadd.f32 %v1783_v24, %v791_v51 }
 0x262   :  { %v843_v58 = vmax.f32 %v811_v54, 0.0  ;;  %v812_v8 = vadd.f32 %v1783_v24, %v789_v28 }
 0x263   :  { %v1126_v42 = vpack.c.bf16 %v845_v56, %v845_v56  ;;  %v846_v59 = vmax.f32 %v814_v57, 0.0 }
 0x264   :  { %v1124_v60 = vpack.c.bf16 %v843_v58, %v843_v58  ;;  %v844_v43 = vmax.f32 %v812_v8, 0.0 }
 0x265   :  { %926 = vst.msk [vmem:[#allocation13 + $0x38] sm:$0xf] %vm911_vm2, %v1126_v42  ;;  %v1127_v30 = vpack.c.bf16 %v846_v59, %v846_v59 }
 0x266   :  { %924 = vst.msk [vmem:[#allocation13 + $0x30] sm:$0xf] %vm911_vm2, %v1124_v60  ;;  %v1125_v61 = vpack.c.bf16 %v844_v43, %v844_v43 }
 0x267   :  { %927 = vst.msk [vmem:[#allocation13 + $0x3c] sm:$0xf] %vm911_vm2, %v1127_v30 }
 0x268   :  { %925 = vst.msk [vmem:[#allocation13 + $0x34] sm:$0xf] %vm911_vm2, %v1125_v61 }
 0x269   :  { %1508 = shalt.err (!%p1505_p4)
}
 0x26a   :  { %s1509_s17 = scalar_lea.hbm %s1854_s6, 1024 }
 0x26b   :  { %p1510_p5 = scmp.ne.s32.totalorder %s1854_s6, %s1509_s17  ;;  %p1513_p6 = scmp.lt.u32.totalorder %s1509_s17, %s1854_s6 }
 0x26d   :  { %p1515_p7 = pnand %p1513_p6, %p1510_p5 }
 0x26f   :  { %1518 = shalt.err (!%p1515_p7)
}
 0x270   :  { %1020 = dma.vmem_to_hbm [thread:$0]  %s1015_s3, 1024, %s1854_s6, [#allocation4], %s1536_s25, %s1536_s25, %s1537_s27  }
 0x271   :  { %1527 = dma.done.wait [#allocation4], 1024  }
 0x272   :  { %1528 = vsyncadd [#allocation4], 4294966272 }
 0x273   :  { %1529 = dma.done.wait [#allocation15], 1024  }
 0x274   :  { %1530 = vsyncadd [#allocation15], 4294966272 }
 0x275   :  { %1039 = vsyncpa [#allocation3], 1 }
 0x276   :  { %1040 = vsyncpa [#allocation6], 1 }
 0x277   :  { %1041 = vsyncpa [#allocation9], 1 }
 0x278   :  { %1042 = vsyncpa [#allocation12], 1 }
 0x279   :  { %1043 = vsyncpa [#allocation4], 1 }
 0x27a   :  { %1044 = vsyncpa [#allocation15], 1 }

// kernel: net_forward.5
= control target key start
LH: loop header
LB: loop body
LE: loop exit
PB: predicated region body
PF: predicated region fallthrough
CT: control target
= control target key end

     0   :  { %13 = vsyncpa [#allocation3], 0  ;;  %s2480_s0 = inlined_call_operand.hbm [shape: bf16[128,128], index: 0, kind: input, shape index: {}]   ;;  %s2481_s1 = inlined_call_operand.hbm [shape: f32[128,1], index: 1, kind: input, shape index: {}]   ;;  %s2482_s2 = inlined_call_operand.hbm [shape: bf16[128,32], index: 2, kind: input, shape index: {}]   ;;  %s2483_s3 = inlined_call_operand.hbm [shape: bf16[32,8], index: 3, kind: input, shape index: {}]   ;;  %s2484_s4 = inlined_call_operand.hbm [shape: f32[1,8], index: 4, kind: input, shape index: {}]   ;;  %s2485_s5 = inlined_call_operand.hbm [shape: bf16[128,8], index: 5, kind: input, shape index: {}]   ;;  %s2486_s6 = inlined_call_operand.hbm [shape: f32[128,8], index: 6, kind: output, shape index: {0}]   ;;  %s2487_s7 = inlined_call_operand.hbm [shape: f32[128,8], index: 7, kind: output, shape index: {1}]  }
   0x1   :  { %14 = vsyncpa [#allocation6], 0 }
   0x2   :  { %15 = vsyncpa [#allocation9], 0 }
   0x3   :  { %16 = vsyncpa [#allocation12], 0 }
   0x4   :  { %17 = vsyncpa [#allocation4], 0 }
   0x5   :  { %18 = vsyncpa [#allocation15], 0  ;;  %s1834_s24 = smov [#allocation5]   ;;  %s1646_s28 = scalar_lea.hbm %s2481_s1, 2048 }
   0x6   :  { %s36_s25 = sshll.u32 %s1834_s24, 4  ;;  %p1647_p0 = scmp.ne.s32.totalorder %s2481_s1, %s1646_s28  ;;  %s37_s25 = int_to_ptr.vmem [resolvable:$true] %s36_s25 }
   0x7   :  { %p1650_p1 = scmp.lt.u32.totalorder %s1646_s28, %s2481_s1 }
   0x9   :  { %p1652_p2 = pnand %p1650_p1, %p1647_p0 }
   0xb   :  { %1655 = shalt.err (!%p1652_p2)
}
   0xc   :  { %s1656_s10 = scalar_lea.vmem %s37_s25, 2048  ;;  %p1661_p4 = scmp.lt.s32.totalorder %s37_s25, %s37_s25 }
   0xd   :  { %p1657_p3 = scmp.ne.s32.totalorder %s37_s25, %s1656_s10  ;;  %p1662_p5 = scmp.lt.s32.totalorder %s1656_s10, %s1656_s10 }
   0xf   :  { %p1663_p6 = por %p1662_p5, %p1661_p4 }
  0x11   :  { %p1664_p7 = pnand %p1663_p6, %p1657_p3 }
  0x13   :  { %1667 = shalt.err (!%p1664_p7)
}
  0x14   :  { %s1835_s11 = smov 128   ;;  %s1836_s12 = smov 8  }
  0x15   :  { %42 = dma.hbm_to_vmem [thread:$0]  %s2481_s1, 2048, %s37_s25, [#allocation6], %s1835_s11, %s1835_s11, %s1836_s12  }
  0x16   :  { %s1837_s15 = smov [#allocation8]   ;;  %s1838_s17 = smov [#allocation2]  }
  0x17   :  { %s60_s16 = sshll.u32 %s1837_s15, 4  ;;  %s24_s18 = sshll.u32 %s1838_s17, 4  ;;  %s61_s16 = int_to_ptr.vmem [resolvable:$true] %s60_s16  ;;  %s25_s18 = int_to_ptr.vmem [resolvable:$true] %s24_s18 }
  0x18   :  { %s1668_s21 = scalar_lea.hbm %s2483_s3, 256 }
  0x19   :  { %p1669_p8 = scmp.ne.s32.totalorder %s2483_s3, %s1668_s21  ;;  %p1672_p9 = scmp.lt.u32.totalorder %s1668_s21, %s2483_s3 }
  0x1b   :  { %p1674_p10 = pnand %p1672_p9, %p1669_p8 }
  0x1d   :  { %1677 = shalt.err (!%p1674_p10)
}
  0x1e   :  { %s1678_s1 = scalar_lea.vmem %s61_s16, 256  ;;  %p1683_p12 = scmp.lt.s32.totalorder %s61_s16, %s61_s16 }
  0x1f   :  { %p1679_p11 = scmp.ne.s32.totalorder %s61_s16, %s1678_s1  ;;  %p1684_p13 = scmp.lt.s32.totalorder %s1678_s1, %s1678_s1 }
  0x21   :  { %p1685_p0 = por %p1684_p13, %p1683_p12 }
  0x23   :  { %p1686_p1 = pnand %p1685_p0, %p1679_p11 }
  0x25   :  { %1689 = shalt.err (!%p1686_p1)
}
  0x26   :  { %s1839_s25 = smov 64   ;;  %s1840_s27 = smov 4  }
  0x27   :  { %66 = dma.hbm_to_vmem [thread:$0]  %s2483_s3, 256, %s61_s16, [#allocation9], %s1839_s25, %s1839_s25, %s1840_s27  }
  0x28   :  { %s1690_s9 = scalar_lea.hbm %s2480_s0, 1024 }
  0x29   :  { %p1691_p2 = scmp.ne.s32.totalorder %s2480_s0, %s1690_s9  ;;  %p1694_p3 = scmp.lt.u32.totalorder %s1690_s9, %s2480_s0 }
  0x2b   :  { %p1696_p4 = pnand %p1694_p3, %p1691_p2 }
  0x2d   :  { %1699 = shalt.err (!%p1696_p4)
}
  0x2e   :  { %s1700_s17 = scalar_lea.vmem %s25_s18, 1024  ;;  %p1705_p6 = scmp.lt.s32.totalorder %s25_s18, %s25_s18 }
  0x2f   :  { %p1701_p5 = scmp.ne.s32.totalorder %s25_s18, %s1700_s17  ;;  %p1706_p7 = scmp.lt.s32.totalorder %s1700_s17, %s1700_s17 }
  0x31   :  { %p1707_p8 = por %p1706_p7, %p1705_p6 }
  0x33   :  { %p1708_p9 = pnand %p1707_p8, %p1701_p5 }
  0x35   :  { %1711 = shalt.err (!%p1708_p9)
}
  0x36   :  { %30 = dma.hbm_to_vmem [thread:$0]  %s2480_s0, 1024, %s25_s18, [#allocation3], %s1839_s25, %s1839_s25, %s1840_s27  }
  0x37   :  { %s1841_s19 = smov [#allocation7]   ;;  %s1842_s21 = smov [#allocation10]  }
  0x38   :  { %s48_s20 = sshll.u32 %s1841_s19, 4  ;;  %s73_s22 = sshll.u32 %s1842_s21, 4  ;;  %s49_s20 = int_to_ptr.vmem [resolvable:$true] %s48_s20  ;;  %s74_s22 = int_to_ptr.vmem [resolvable:$true] %s73_s22 }
  0x39   :  { %s1712_s26 = scalar_lea.hbm %s2482_s2, 1024 }
  0x3a   :  { %p1713_p10 = scmp.ne.s32.totalorder %s2482_s2, %s1712_s26  ;;  %p1716_p11 = scmp.lt.u32.totalorder %s1712_s26, %s2482_s2 }
  0x3c   :  { %p1718_p12 = pnand %p1716_p11, %p1713_p10 }
  0x3e   :  { %1721 = shalt.err (!%p1718_p12)
}
  0x3f   :  { %s1722_s0 = scalar_lea.vmem %s49_s20, 1024  ;;  %p1727_p0 = scmp.lt.s32.totalorder %s49_s20, %s49_s20 }
  0x40   :  { %p1723_p13 = scmp.ne.s32.totalorder %s49_s20, %s1722_s0  ;;  %p1728_p1 = scmp.lt.s32.totalorder %s1722_s0, %s1722_s0 }
  0x42   :  { %p1729_p2 = por %p1728_p1, %p1727_p0 }
  0x44   :  { %p1730_p3 = pnand %p1729_p2, %p1723_p13 }
  0x46   :  { %1733 = shalt.err (!%p1730_p3)
}
  0x47   :  { %54 = dma.hbm_to_vmem [thread:$0]  %s2482_s2, 1024, %s49_s20, [#allocation6], %s1839_s25, %s1839_s25, %s1840_s27  }
  0x48   :  { %s1734_s13 = scalar_lea.hbm %s2484_s4, 16 }
  0x49   :  { %p1735_p4 = scmp.ne.s32.totalorder %s2484_s4, %s1734_s13  ;;  %p1738_p5 = scmp.lt.u32.totalorder %s1734_s13, %s2484_s4 }
  0x4b   :  { %p1740_p6 = pnand %p1738_p5, %p1735_p4 }
  0x4d   :  { %1743 = shalt.err (!%p1740_p6)
}
  0x4e   :  { %s1744_s16 = scalar_lea.vmem %s74_s22, 16  ;;  %s1748_s19 = scalar_lea.vmem %s74_s22, 32 }
  0x4f   :  { %p1745_p7 = scmp.ne.s32.totalorder %s74_s22, %s1744_s16  ;;  %p1749_p8 = scmp.lt.s32.totalorder %s74_s22, %s74_s22 }
  0x50   :  { %p1750_p9 = scmp.lt.s32.totalorder %s1748_s19, %s1744_s16 }
  0x52   :  { %p1751_p10 = por %p1750_p9, %p1749_p8 }
  0x54   :  { %p1752_p11 = pnand %p1751_p10, %p1745_p7 }
  0x56   :  { %1755 = shalt.err (!%p1752_p11)
}
  0x57   :  { %76 = dma.hbm_to_vmem [thread:$0]  %s2484_s4, 16, %s74_s22, [#allocation9]  }
  0x58   :  { %s1843_s21 = smov [#allocation11]   ;;  %s1756_s1 = scalar_lea.hbm %s2485_s5, 1024 }
  0x59   :  { %s82_s23 = sshll.u32 %s1843_s21, 4  ;;  %p1757_p12 = scmp.ne.s32.totalorder %s2485_s5, %s1756_s1  ;;  %s83_s23 = int_to_ptr.vmem [resolvable:$true] %s82_s23 }
  0x5a   :  { %p1760_p13 = scmp.lt.u32.totalorder %s1756_s1, %s2485_s5 }
  0x5c   :  { %p1762_p0 = pnand %p1760_p13, %p1757_p12 }
  0x5e   :  { %1765 = shalt.err (!%p1762_p0)
}
  0x5f   :  { %s1766_s18 = scalar_lea.vmem %s83_s23, 1024  ;;  %p1771_p2 = scmp.lt.s32.totalorder %s83_s23, %s83_s23 }
  0x60   :  { %p1767_p1 = scmp.ne.s32.totalorder %s83_s23, %s1766_s18  ;;  %p1772_p3 = scmp.lt.s32.totalorder %s1766_s18, %s1766_s18 }
  0x62   :  { %p1773_p4 = por %p1772_p3, %p1771_p2 }
  0x64   :  { %p1774_p5 = pnand %p1773_p4, %p1767_p1 }
  0x66   :  { %1777 = shalt.err (!%p1774_p5)
}
  0x67   :  { %88 = dma.hbm_to_vmem [thread:$0]  %s2485_s5, 1024, %s83_s23, [#allocation12], %s1839_s25, %s1839_s25, %s1840_s27  }
  0x68   :  { %1822 = dma.done.wait [#allocation3], 1024  }
  0x69   :  { %1823 = vsyncadd [#allocation3], 4294966272 }
  0x6a   :  { %1824 = dma.done.wait [#allocation6], 3072  }
  0x6b   :  { %1825 = vsyncadd [#allocation6], 4294964224 }
  0x6c   :  { %1826 = dma.done.wait [#allocation9], 272  }
  0x6d   :  { %1827 = vsyncadd [#allocation9], 4294967024 }
  0x6e   :  { %1828 = dma.done.wait [#allocation12], 1024  }
  0x6f   :  { %1829 = vsyncadd [#allocation12], 4294966272  ;;  %v1844_v0 = vmov 0   ;;  %v1460_v1 = vld [vmem:[#allocation8] sm:$0xff]   ;;  %v1461_v2 = vld [vmem:[#allocation8 + $0x8] sm:$0xff]   ;;  %vm180_vm0 = vcmask 261120  }
  0x70   :  { %1459 = vset.pattern.permute.xlu1 %v1844_v0  ;;  %1458 = vset.pattern.permute.xlu0 %v1844_v0  ;;  %v1462_v3 = vld [vmem:[#allocation7] sm:$0xff]   ;;  %v1463_v4 = vld [vmem:[#allocation7 + $0x8] sm:$0xff]   ;;  %v1464_v5 = vld [vmem:[#allocation7 + $0x10] sm:$0xff]   ;;  %s1845_s5 = smov [#allocation13]   ;;  %s1846_s27 = smov [#allocation14]  }
  0x71   :  { %1361 = vmatprep.subr.bf16.mxu0 %v1460_v1  ;;  %1365 = vmatprep.mubr.msk.bf16.mxu0 %vm180_vm0, %v1462_v3  ;;  %v1468_v6 = vld [vmem:[#allocation11] sm:$0xff]   ;;  %v1469_v7 = vld [vmem:[#allocation11 + $0x8] sm:$0xff]   ;;  %v1472_v8 = vld [vmem:[#allocation11 + $0x10] sm:$0xff]   ;;  %s1253_s25 = sshll.u32 %s1845_s5, 4  ;;  %s1265_s8 = sshll.u32 %s1846_s27, 4  ;;  %s1254_s25 = int_to_ptr.vmem [resolvable:$true] %s1253_s25  ;;  %s1266_s8 = int_to_ptr.vmem [resolvable:$true] %s1265_s8 }
  0x72   :  { %1362 = vmatpush3.bf16.msra.mxu0 %v1460_v1  ;;  %v1465_v9 = vld [vmem:[#allocation7 + $0x18] sm:$0xff]   ;;  %v1466_v10 = vld [vmem:[#allocation7 + $0x20] sm:$0xff]   ;;  %v1473_v11 = vld [vmem:[#allocation11 + $0x18] sm:$0xff]   ;;  %s1778_s9 = scalar_lea.vmem %s1254_s25, 2048  ;;  %p1783_p7 = scmp.lt.s32.totalorder %s1254_s25, %s1254_s25 }
  0x73   :  { %1363 = vmatprep.subr.bf16.mxu0 %v1461_v2  ;;  %v1478_v12 = vld [vmem:[#allocation2] sm:$0xff]   ;;  %v1474_v13 = vld [vmem:[#allocation11 + $0x20] sm:$0xff]   ;;  %v1467_v14 = vld [vmem:[#allocation7 + $0x28] sm:$0xff]   ;;  %p1779_p6 = scmp.ne.s32.totalorder %s1254_s25, %s1778_s9  ;;  %p1784_p8 = scmp.lt.s32.totalorder %s1778_s9, %s1778_s9 }
  0x74   :  { %1397 = vmatprep.mubr.bf16.mxu1 %v1478_v12  ;;  %v1470_v15 = vld [vmem:[#allocation7 + $0x30] sm:$0xff]   ;;  %v1475_v16 = vld [vmem:[#allocation11 + $0x28] sm:$0xff]   ;;  %v637_v20 = vld [vmem:[#allocation5 + $0x28] sm:$0xff] }
  0x75   :  { %v634_v17 = vld [vmem:[#allocation5 + $0x10] sm:$0xff]  ;;  %v635_v18 = vld [vmem:[#allocation5 + $0x18] sm:$0xff]  ;;  %v632_v19 = vld [vmem:[#allocation5] sm:$0xff]  ;;  %vm653_vm5 = vcmp.eq.f32.partialorder %v637_v20, 0.0  ;;  %p1785_p9 = por %p1784_p8, %p1783_p7 }
  0x76   :  { %1364 = vmatpush3.bf16.msra.mxu0 %v1461_v2  ;;  %1486 = vrcp.f32 %v634_v17  ;;  %v1476_v21 = vld [vmem:[#allocation11 + $0x30] sm:$0xff]   ;;  %v1471_v23 = vld [vmem:[#allocation7 + $0x38] sm:$0xff]   ;;  %v1477_v25 = vld [vmem:[#allocation11 + $0x38] sm:$0xff]   ;;  %vm650_vm1 = vcmp.eq.f32.partialorder %v634_v17, 0.0  ;;  %vm651_vm2 = vcmp.eq.f32.partialorder %v635_v18, 0.0  ;;  %vm648_vm3 = vcmp.eq.f32.partialorder %v632_v19, 0.0 }
  0x77   :  { %1413 = vmatprep.subr.bf16.mxu0 %v1468_v6  ;;  %1488 = vrcp.f32 %v635_v18  ;;  %v633_v22 = vld [vmem:[#allocation5 + $0x8] sm:$0xff]  ;;  %v636_v24 = vld [vmem:[#allocation5 + $0x20] sm:$0xff]  ;;  %v639_v26 = vld [vmem:[#allocation5 + $0x38] sm:$0xff]  ;;  %p1786_p10 = pnand %p1785_p9, %p1779_p6 }
  0x78   :  { %1490 = vrcp.f32 %v632_v19  ;;  %v638_v27 = vld [vmem:[#allocation5 + $0x30] sm:$0xff]  ;;  %v641_v28 = vld [vmem:[#allocation5 + $0x48] sm:$0xff]  ;;  %v640_v33 = vld [vmem:[#allocation5 + $0x40] sm:$0xff]  ;;  %vm649_vm4 = vcmp.eq.f32.partialorder %v633_v22, 0.0  ;;  %vm652_vm6 = vcmp.eq.f32.partialorder %v636_v24, 0.0  ;;  %vm655_vm7 = vcmp.eq.f32.partialorder %v639_v26, 0.0 }
  0x79   :  { %1366 = vmatmul.mubr.msk.bf16.vlgmr.msra.gmra.mrb[0].mxu0 %vm180_vm0, %v1463_v4  ;;  %1492 = vrcp.f32 %v637_v20  ;;  %v1982_v31 = vld [vmem:[#allocation2 + $0x8] sm:$0xff]   ;;  %v1984_v35 = vld [vmem:[#allocation2 + $0x10] sm:$0xff]   ;;  %v643_v39 = vld [vmem:[#allocation5 + $0x58] sm:$0xff]  ;;  %vm654_vm8 = vcmp.eq.f32.partialorder %v638_v27, 0.0  ;;  %vm657_vm9 = vcmp.eq.f32.partialorder %v641_v28, 0.0  ;;  %vm656_vm10 = vcmp.eq.f32.partialorder %v640_v33, 0.0 }
  0x7a   :  { %1369 = vmatprep.mubr.msk.bf16.mxu0 %vm180_vm0, %v1464_v5  ;;  %1414 = vmatpush3.bf16.msra.mxu0 %v1468_v6  ;;  %1494 = vrcp.f32 %v633_v22  ;;  %v642_v42 = vld [vmem:[#allocation5 + $0x50] sm:$0xff]  ;;  %v645_v45 = vld [vmem:[#allocation5 + $0x68] sm:$0xff]  ;;  %v1988_v47 = vld [vmem:[#allocation2 + $0x18] sm:$0xff]   ;;  %vm659_vm11 = vcmp.eq.f32.partialorder %v643_v39, 0.0 }
  0x7b   :  { %1415 = vmatprep.subr.bf16.mxu0 %v1469_v7  ;;  %1496 = vrcp.f32 %v636_v24  ;;  %v644_v49 = vld [vmem:[#allocation5 + $0x60] sm:$0xff]  ;;  %v1994_v58 = vld [vmem:[#allocation2 + $0x28] sm:$0xff]   ;;  %v1996_v61 = vld [vmem:[#allocation2 + $0x30] sm:$0xff]   ;;  %vm658_vm12 = vcmp.eq.f32.partialorder %v642_v42, 0.0  ;;  %vm661_vm13 = vcmp.eq.f32.partialorder %v645_v45, 0.0 }
  0x7c   :  { %1498 = vrcp.f32 %v639_v26  ;;  %v1990_v51 = vld [vmem:[#allocation2 + $0x20] sm:$0xff]   ;;  %vm660_vm14 = vcmp.eq.f32.partialorder %v644_v49, 0.0  ;;  %v2000_v3 = vld [vmem:[#allocation2 + $0x38] sm:$0xff]   ;;  %v646_v6 = vld [vmem:[#allocation5 + $0x70] sm:$0xff] }
  0x7d   :  { %1500 = vrcp.f32 %v638_v27  ;;  %v647_v5 = vld [vmem:[#allocation5 + $0x78] sm:$0xff] }
  0x7e   :  { %1416 = vmatpush3.bf16.msra.mxu0 %v1469_v7  ;;  %1502 = vrcp.f32 %v641_v28  ;;  %vm663_vm15 = vcmp.eq.f32.partialorder %v647_v5, 0.0 }
  0x7f   :  { %1417 = vmatprep.subr.bf16.mxu0 %v1472_v8  ;;  %1504 = vrcp.f32 %v640_v33 }
  0x80   :  { %v1487_v29 = vpop.eup %1486  ;;  %1506 = vrcp.f32 %v643_v39 }
  0x81   :  { %1370 = vmatmul.mubr.msk.bf16.gmra.mrb[4].mxu0 %vm180_vm0, %v1465_v9  ;;  %v1489_v30 = vpop.eup %1488  ;;  %v682_v32 = vsel %vm650_vm1, 0.0, %v1487_v29  ;;  %1508 = vrcp.f32 %v642_v42  ;;  %vm831_vm1 = vcmask 64512  }
  0x82   :  { %1373 = vmatprep.mubr.msk.bf16.mxu0 %vm180_vm0, %v1466_v10  ;;  %1418 = vmatpush3.bf16.msra.mxu0 %v1472_v8  ;;  %v1491_v34 = vpop.eup %1490  ;;  %v683_v37 = vsel %vm651_vm2, 0.0, %v1489_v30  ;;  %1510 = vrcp.f32 %v645_v45 }
  0x83   :  { %1419 = vmatprep.subr.bf16.mxu0 %v1473_v11  ;;  %708 = vperm.xlu1 %1459, %v682_v32   ;;  %v1493_v36 = vpop.eup %1492  ;;  %v680_v38 = vsel %vm648_vm3, 0.0, %v1491_v34  ;;  %1512 = vrcp.f32 %v644_v49 }
  0x84   :  { %v1495_v40 = vpop.eup %1494  ;;  %698 = vperm.xlu0 %1458, %v680_v38   ;;  %v685_v44 = vsel %vm653_vm5, 0.0, %v1493_v36  ;;  %1514 = vrcp.f32 %v647_v5 }
  0x85   :  { %v681_v41 = vsel %vm649_vm4, 0.0, %v1495_v40  ;;  %v1497_v43 = vpop.eup %1496  ;;  %1516 = vrcp.f32 %v646_v6 }
  0x86   :  { %1420 = vmatpush3.bf16.msra.mxu0 %v1473_v11  ;;  %v1499_v46 = vpop.eup %1498  ;;  %v684_v48 = vsel %vm652_vm6, 0.0, %v1497_v43 }
  0x87   :  { %1421 = vmatprep.subr.bf16.mxu0 %v1474_v13  ;;  %713 = vperm.xlu1 %1459, %v683_v37   ;;  %v1501_v50 = vpop.eup %1500  ;;  %v687_v52 = vsel %vm655_vm7, 0.0, %v1499_v46 }
  0x88   :  { %703 = vperm.xlu0 %1458, %v681_v41   ;;  %v1503_v53 = vpop.eup %1502  ;;  %v686_v54 = vsel %vm654_vm8, 0.0, %v1501_v50 }
  0x89   :  { %1374 = vmatmul.mubr.msk.bf16.gmra.mrb[8].mxu0 %vm180_vm0, %v1467_v14  ;;  %v1505_v55 = vpop.eup %1504  ;;  %v689_v56 = vsel %vm657_vm9, 0.0, %v1503_v53 }
  0x8a   :  { %1377 = vmatprep.mubr.msk.bf16.mxu0 %vm180_vm0, %v1470_v15  ;;  %1422 = vmatpush3.bf16.msra.mxu0 %v1474_v13  ;;  %v1507_v57 = vpop.eup %1506  ;;  %v688_v59 = vsel %vm656_vm10, 0.0, %v1505_v55 }
  0x8b   :  { %1423 = vmatprep.subr.bf16.mxu0 %v1475_v16  ;;  %723 = vperm.xlu1 %1459, %v685_v44   ;;  %v1509_v60 = vpop.eup %1508  ;;  %v691_v62 = vsel %vm659_vm11, 0.0, %v1507_v57 }
  0x8c   :  { %718 = vperm.xlu0 %1458, %v684_v48   ;;  %v1511_v63 = vpop.eup %1510  ;;  %v690_v0 = vsel %vm658_vm12, 0.0, %v1509_v60 }
  0x8d   :  { %v1513_v1 = vpop.eup %1512  ;;  %v693_v2 = vsel %vm661_vm13, 0.0, %v1511_v63 }
  0x8e   :  { %1424 = vmatpush3.bf16.msra.mxu0 %v1475_v16  ;;  %v692_v4 = vsel %vm660_vm14, 0.0, %v1513_v1  ;;  %v1515_v7 = vpop.eup %1514 }
  0x8f   :  { %1425 = vmatprep.subr.bf16.mxu0 %v1476_v21  ;;  %733 = vperm.xlu1 %1459, %v687_v52   ;;  %v1517_v8 = vpop.eup %1516  ;;  %v695_v9 = vsel %vm663_vm15, 0.0, %v1515_v7 }
  0x90   :  { %728 = vperm.xlu0 %1458, %v686_v54  }
  0x91   :  { %1378 = vmatmul.mubr.msk.bf16.gmra.mrb[12].mxu0 %vm180_vm0, %v1471_v23  ;;  %vm662_vm0 = vcmp.eq.f32.partialorder %v646_v6, 0.0 }
  0x92   :  { %1426 = vmatpush3.bf16.msra.mxu0 %v1476_v21  ;;  %1429 = vmatprep.mubr.bf16.mxu0 %v1478_v12  ;;  %v694_v10 = vsel %vm662_vm0, 0.0, %v1517_v8 }
  0x93   :  { %1427 = vmatprep.subr.bf16.mxu0 %v1477_v25  ;;  %743 = vperm.xlu1 %1459, %v689_v56  }
  0x94   :  { %738 = vperm.xlu0 %1458, %v688_v59  }
  0x96   :  { %1428 = vmatpush3.bf16.msra.mxu0 %v1477_v25 }
  0x97   :  { %753 = vperm.xlu1 %1459, %v691_v62  }
  0x98   :  { %748 = vperm.xlu0 %1458, %v690_v0  }
  0x99   :  { %1430 = vmatmul.mubr.bf16.vlgmr.msra.gmra.mrb[16].mxu0 %v1982_v31 }
  0x9a   :  { %1433 = vmatprep.mubr.bf16.mxu0 %v1984_v35 }
  0x9b   :  { %763 = vperm.xlu1 %1459, %v693_v2  }
  0x9c   :  { %758 = vperm.xlu0 %1458, %v692_v4  }
  0x9f   :  { %773 = vperm.xlu1 %1459, %v695_v9  }
  0xa0   :  { %768 = vperm.xlu0 %1458, %v694_v10  }
  0xa1   :  { %1434 = vmatmul.mubr.bf16.gmra.mrb[20].mxu0 %v1988_v47 }
  0xa2   :  { %1437 = vmatprep.mubr.bf16.mxu0 %v1990_v51 }
  0xa9   :  { %1438 = vmatmul.mubr.bf16.gmra.mrb[24].mxu0 %v1994_v58 }
  0xaa   :  { %1441 = vmatprep.mubr.bf16.mxu0 %v1996_v61 }
  0xb1   :  { %1442 = vmatmul.mubr.bf16.gmra.mrb[28].mxu0 %v2000_v3 }
 0x102   :  { %v2005_v27 = vpop.permute.xlu1 %708 }
 0x103   :  { %v2003_v24 = vpop.permute.xlu0 %698 }
 0x106   :  { %v2009_v34 = vpop.permute.xlu1 %713 }
 0x107   :  { %v2007_v32 = vpop.permute.xlu0 %703 }
 0x10a   :  { %v2013_v42 = vpop.permute.xlu1 %723 }
 0x10b   :  { %v2011_v41 = vpop.permute.xlu0 %718 }
 0x10e   :  { %v2031_v55 = vpop.permute.xlu1 %733 }
 0x10f   :  { %v2021_v49 = vpop.permute.xlu0 %728 }
 0x113   :  { %v2041_v62 = vpop.permute.xlu0 %738 }
 0x117   :  { %v2064_v9 = vpop.permute.xlu0 %748 }
 0x14c   :  { %v1367_v11 = vpop.f32.mrb[0].mxu0 }
 0x14d   :  { %v239_v12 = vpop.f32.mrb[1].mxu0 }
 0x14e   :  { %v1368_v13 = vpop.f32.mrb[2].mxu0 }
 0x14f   :  { %v319_v14 = vpack.c.bf16 %v1368_v13, %v1367_v11  ;;  %v242_v15 = vpop.f32.mrb[3].mxu0 }
 0x150   :  { %v318_v16 = vpack.c.bf16 %v242_v15, %v239_v12 }
 0x152   :  { %1381 = vmatprep.subr.bf16.mxu1 %v318_v16 }
 0x153   :  { %1382 = vmatpush3.bf16.msra.mxu1 %v318_v16 }
 0x154   :  { %v1371_v17 = vpop.f32.mrb[4].mxu0  ;;  %1383 = vmatprep.subr.bf16.mxu1 %v319_v14 }
 0x155   :  { %v255_v18 = vpop.f32.mrb[5].mxu0 }
 0x156   :  { %v1372_v19 = vpop.f32.mrb[6].mxu0 }
 0x157   :  { %v321_v20 = vpack.c.bf16 %v1372_v19, %v1371_v17  ;;  %v258_v21 = vpop.f32.mrb[7].mxu0  ;;  %1384 = vmatpush3.bf16.msra.mxu1 %v319_v14 }
 0x158   :  { %v320_v22 = vpack.c.bf16 %v258_v21, %v255_v18 }
 0x15a   :  { %1385 = vmatprep.subr.bf16.mxu1 %v320_v22 }
 0x15b   :  { %1386 = vmatpush3.bf16.msra.mxu1 %v320_v22  ;;  %v2093_v22 = vpop.permute.xlu0 %758 }
 0x15c   :  { %v1375_v23 = vpop.f32.mrb[8].mxu0  ;;  %1387 = vmatprep.subr.bf16.mxu1 %v321_v20 }
 0x15d   :  { %v271_v25 = vpop.f32.mrb[9].mxu0 }
 0x15e   :  { %v1376_v26 = vpop.f32.mrb[10].mxu0 }
 0x15f   :  { %v323_v28 = vpack.c.bf16 %v1376_v26, %v1375_v23  ;;  %v274_v29 = vpop.f32.mrb[11].mxu0  ;;  %1388 = vmatpush3.bf16.msra.mxu1 %v321_v20 }
 0x160   :  { %v322_v30 = vpack.c.bf16 %v274_v29, %v271_v25 }
 0x162   :  { %1389 = vmatprep.subr.bf16.mxu1 %v322_v30 }
 0x163   :  { %1390 = vmatpush3.bf16.msra.mxu1 %v322_v30 }
 0x164   :  { %v1379_v33 = vpop.f32.mrb[12].mxu0  ;;  %1391 = vmatprep.subr.bf16.mxu1 %v323_v28 }
 0x165   :  { %v287_v36 = vpop.f32.mrb[13].mxu0 }
 0x166   :  { %v1380_v37 = vpop.f32.mrb[14].mxu0 }
 0x167   :  { %v325_v38 = vpack.c.bf16 %v1380_v37, %v1379_v33  ;;  %v290_v39 = vpop.f32.mrb[15].mxu0  ;;  %1392 = vmatpush3.bf16.msra.mxu1 %v323_v28 }
 0x168   :  { %v324_v40 = vpack.c.bf16 %v290_v39, %v287_v36 }
 0x16a   :  { %1393 = vmatprep.subr.bf16.mxu1 %v324_v40 }
 0x16b   :  { %1394 = vmatpush3.bf16.msra.mxu1 %v324_v40 }
 0x16c   :  { %1395 = vmatprep.subr.bf16.mxu1 %v325_v38  ;;  %v1431_v43 = vpop.f32.mrb[16].mxu0 }
 0x16d   :  { %v2016_v44 = vmul.f32 %v1431_v43, %v2005_v27  ;;  %v569_v45 = vpop.f32.mrb[17].mxu0 }
 0x16e   :  { %v2019_v46 = vmul.f32 %v2003_v24, %v569_v45  ;;  %v1432_v48 = vpop.f32.mrb[18].mxu0 }
 0x16f   :  { %1396 = vmatpush3.bf16.msra.mxu1 %v325_v38  ;;  %v2024_v50 = vmul.f32 %v1432_v48, %v2009_v34  ;;  %v572_v52 = vpop.f32.mrb[19].mxu0  ;;  %v1030_v53 = vsel %vm831_vm1, %v2016_v44, -inf  ;;  %v2114_v38 = vld [vmem:[#allocation10] ss:$0 sm:$0xff]  ;;  %v2118_v48 = vpop.permute.xlu0 %768 }
 0x170   :  { %v2029_v54 = vmul.f32 %v2007_v32, %v572_v52  ;;  %1031 = vmax.xlane.f32.xlu1 %v1030_v53  ;;  %v1024_v57 = vsel %vm831_vm1, %v2019_v46, -inf }
 0x171   :  { %v1033_v56 = vsel %vm831_vm1, %v2024_v50, -inf }
 0x172   :  { %1398 = vmatmul.mubr.bf16.vlgmr.msra.gmra.mrb[0].mxu1 %v1982_v31  ;;  %1034 = vmax.xlane.f32.xlu0 %v1033_v56  ;;  %v1027_v59 = vsel %vm831_vm1, %v2029_v54, -inf  ;;  %v2049_v31 = vpop.permute.xlu1 %743 }
 0x173   :  { %1401 = vmatprep.mubr.bf16.mxu1 %v1984_v35 }
 0x174   :  { %v1435_v60 = vpop.f32.mrb[20].mxu0  ;;  %1025 = vmax.xlane.f32.xlu1 %v1024_v57 }
 0x175   :  { %v585_v63 = vpop.f32.mrb[21].mxu0  ;;  %v2044_v0 = vmul.f32 %v1435_v60, %v2021_v49 }
 0x176   :  { %v2047_v1 = vmul.f32 %v2011_v41, %v585_v63  ;;  %1028 = vmax.xlane.f32.xlu0 %v1027_v59  ;;  %v1436_v2 = vpop.f32.mrb[22].mxu0  ;;  %v2069_v12 = vpop.permute.xlu1 %753 }
 0x177   :  { %v2052_v35 = vmul.f32 %v1436_v2, %v2031_v55  ;;  %v588_v4 = vpop.f32.mrb[23].mxu0  ;;  %v1042_v5 = vsel %vm831_vm1, %v2044_v0, -inf }
 0x178   :  { %v2057_v6 = vmul.f32 %v2013_v42, %v588_v4  ;;  %1043 = vmax.xlane.f32.xlu1 %v1042_v5  ;;  %v1036_v8 = vsel %vm831_vm1, %v2047_v1, -inf }
 0x179   :  { %v1045_v7 = vsel %vm831_vm1, %v2052_v35, -inf }
 0x17a   :  { %1402 = vmatmul.mubr.bf16.gmra.mrb[4].mxu1 %v1988_v47  ;;  %1046 = vmax.xlane.f32.xlu0 %v1045_v7  ;;  %v1039_v10 = vsel %vm831_vm1, %v2057_v6, -inf  ;;  %v2097_v26 = vpop.permute.xlu1 %763 }
 0x17b   :  { %1405 = vmatprep.mubr.bf16.mxu1 %v1990_v51 }
 0x17c   :  { %v1439_v11 = vpop.f32.mrb[24].mxu0  ;;  %1037 = vmax.xlane.f32.xlu1 %v1036_v8 }
 0x17d   :  { %v601_v13 = vpop.f32.mrb[25].mxu0  ;;  %v2072_v14 = vmul.f32 %v1439_v11, %v2064_v9 }
 0x17e   :  { %v2075_v15 = vmul.f32 %v2041_v62, %v601_v13  ;;  %1040 = vmax.xlane.f32.xlu0 %v1039_v10  ;;  %v1440_v47 = vpop.f32.mrb[26].mxu0  ;;  %v2112_v36 = vpop.permute.xlu1 %773 }
 0x17f   :  { %v2078_v16 = vmul.f32 %v1440_v47, %v2069_v12  ;;  %v604_v51 = vpop.f32.mrb[27].mxu0  ;;  %v1054_v17 = vsel %vm831_vm1, %v2072_v14, -inf }
 0x180   :  { %v2083_v18 = vmul.f32 %v2049_v31, %v604_v51  ;;  %1055 = vmax.xlane.f32.xlu1 %v1054_v17  ;;  %v1048_v20 = vsel %vm831_vm1, %v2075_v15, -inf }
 0x181   :  { %v1057_v19 = vsel %vm831_vm1, %v2078_v16, -inf }
 0x182   :  { %1406 = vmatmul.mubr.bf16.gmra.mrb[8].mxu1 %v1994_v58  ;;  %1058 = vmax.xlane.f32.xlu0 %v1057_v19  ;;  %v1051_v21 = vsel %vm831_vm1, %v2083_v18, -inf }
 0x183   :  { %1409 = vmatprep.mubr.bf16.mxu1 %v1996_v61 }
 0x184   :  { %v2095_v23 = vpop.f32.mrb[28].mxu0  ;;  %1049 = vmax.xlane.f32.xlu1 %v1048_v20 }
 0x185   :  { %v617_v25 = vpop.f32.mrb[29].mxu0 }
 0x186   :  { %v2099_v28 = vpop.f32.mrb[30].mxu0  ;;  %1052 = vmax.xlane.f32.xlu0 %v1051_v21  ;;  %v2102_v29 = vmul.f32 %v2093_v22, %v617_v25 }
 0x187   :  { %v620_v58 = vpop.f32.mrb[31].mxu0 }
 0x188   :  { %v2105_v61 = vmul.f32 %v2097_v26, %v620_v58  ;;  %v1060_v30 = vsel %vm831_vm1, %v2102_v29, -inf }
 0x189   :  { %1061 = vmax.xlane.f32.xlu1 %v1060_v30 }
 0x18a   :  { %1410 = vmatmul.mubr.bf16.gmra.mrb[12].mxu1 %v2000_v3  ;;  %v1063_v33 = vsel %vm831_vm1, %v2105_v61, -inf }
 0x18b   :  { %1064 = vmax.xlane.f32.xlu0 %v1063_v33 }
 0x1fd   :  { %v1032_v57 = vpop.xlane.xlu1 %1031 }
 0x201   :  { %v1026_v10 = vpop.xlane.xlu1 %1025 }
 0x205   :  { %v1044_v21 = vpop.xlane.xlu1 %1043 }
 0x245   :  { %v1399_v37 = vpop.f32.mrb[0].mxu1 }
 0x246   :  { %v778_v39 = vmul.f32 %v1399_v37, %v2005_v27  ;;  %v408_v40 = vpop.f32.mrb[1].mxu1 }
 0x247   :  { %v776_v43 = vmul.f32 %v2003_v24, %v408_v40  ;;  %v1400_v45 = vpop.f32.mrb[2].mxu1 }
 0x248   :  { %v411_v52 = vpop.f32.mrb[3].mxu1  ;;  %v2121_v3 = vadd.f32 %v2114_v38, %v778_v39  ;;  %v779_v53 = vmul.f32 %v1400_v45, %v2009_v34  ;;  %v1035_v34 = vpop.xlane.xlu0 %1034  ;;  %v2171_v45 = vsub.f32 %v2019_v46, %v1026_v10  ;;  %v2185_v46 = vsub.f32 %v2016_v44, %v1032_v57 }
 0x249   :  { %v777_v56 = vmul.f32 %v2007_v32, %v411_v52  ;;  %v2128_v27 = vadd.f32 %v2114_v38, %v776_v43  ;;  %v2201_v10 = vsub.f32 %v2024_v50, %v1035_v34 }
 0x24a   :  { %v838_v59 = vsel %vm831_vm1, %v2121_v3, -inf  ;;  %v2136_v2 = vadd.f32 %v2114_v38, %v779_v53 }
 0x24b   :  { %839 = vmax.xlane.f32.xlu0 %v838_v59  ;;  %v2131_v24 = vadd.f32 %v2114_v38, %v777_v56  ;;  %v832_v5 = vsel %vm831_vm1, %v2128_v27, -inf }
 0x24c   :  { %v841_v51 = vsel %vm831_vm1, %v2136_v2, -inf }
 0x24d   :  { %v1403_v60 = vpop.f32.mrb[4].mxu1  ;;  %v835_v63 = vsel %vm831_vm1, %v2131_v24, -inf }
 0x24e   :  { %v782_v32 = vmul.f32 %v1403_v60, %v2021_v49  ;;  %836 = vmax.xlane.f32.xlu1 %v835_v63  ;;  %v424_v4 = vpop.f32.mrb[5].mxu1  ;;  %v1038_v60 = vpop.xlane.xlu1 %1037  ;;  %v1088_v63 = vmul.f32 1.442695, %v2171_v45 }
 0x24f   :  { %v780_v7 = vmul.f32 %v2011_v41, %v424_v4  ;;  %833 = vmax.xlane.f32.xlu0 %v832_v5  ;;  %v1404_v8 = vpop.f32.mrb[6].mxu1 }
 0x250   :  { %v783_v11 = vmul.f32 %v1404_v8, %v2031_v55  ;;  %v427_v13 = vpop.f32.mrb[7].mxu1  ;;  %v2144_v47 = vadd.f32 %v2114_v38, %v782_v32  ;;  %v1029_v55 = vpop.xlane.xlu0 %1028  ;;  %1518 = vpow2.f32 %v1088_v63 }
 0x251   :  { %v781_v49 = vmul.f32 %v2013_v42, %v427_v13  ;;  %v2152_v19 = vadd.f32 %v2114_v38, %v780_v7 }
 0x252   :  { %v850_v17 = vsel %vm831_vm1, %v2144_v47, -inf  ;;  %v2155_v41 = vadd.f32 %v2114_v38, %v783_v11  ;;  %v1092_v11 = vmul.f32 1.442695, %v2185_v46  ;;  %v1056_v50 = vpop.xlane.xlu1 %1055 }
 0x253   :  { %842 = vmax.xlane.f32.xlu0 %v841_v51  ;;  %851 = vmax.xlane.f32.xlu1 %v850_v17  ;;  %v844_v42 = vsel %vm831_vm1, %v2152_v19, -inf  ;;  %v2163_v33 = vadd.f32 %v2114_v38, %v781_v49  ;;  %v2260_v63 = vsub.f32 %v2072_v14, %v1056_v50 }
 0x254   :  { %v853_v30 = vsel %vm831_vm1, %v2155_v41, -inf  ;;  %v1047_v53 = vpop.xlane.xlu0 %1046  ;;  %1520 = vpow2.f32 %v1092_v11 }
 0x255   :  { %v1407_v20 = vpop.f32.mrb[8].mxu1  ;;  %v847_v56 = vsel %vm831_vm1, %v2163_v33, -inf }
 0x256   :  { %v786_v25 = vmul.f32 %v1407_v20, %v2064_v9  ;;  %v440_v58 = vpop.f32.mrb[9].mxu1 }
 0x257   :  { %v784_v37 = vmul.f32 %v2041_v62, %v440_v58  ;;  %845 = vmax.xlane.f32.xlu1 %v844_v42  ;;  %854 = vmax.xlane.f32.xlu0 %v853_v30  ;;  %v1408_v39 = vpop.f32.mrb[10].mxu1  ;;  %v2225_v30 = vsub.f32 %v2044_v0, %v1044_v21 }
 0x258   :  { %v787_v40 = vmul.f32 %v1408_v39, %v2069_v12  ;;  %v443_v43 = vpop.f32.mrb[11].mxu1  ;;  %v2168_v9 = vadd.f32 %v2114_v38, %v786_v25  ;;  %v1041_v13 = vpop.xlane.xlu0 %1040  ;;  %v2233_v39 = vmul.f32 %v2095_v23, %v2118_v48 }
 0x259   :  { %v785_v52 = vmul.f32 %v2049_v31, %v443_v43  ;;  %v2179_v59 = vadd.f32 %v2114_v38, %v784_v37  ;;  %v2188_v31 = vsub.f32 %v2029_v54, %v1029_v55  ;;  %v1100_v21 = vmul.f32 1.442695, %v2225_v30  ;;  %v1050_v23 = vpop.xlane.xlu1 %1049 }
 0x25a   :  { %v862_v62 = vsel %vm831_vm1, %v2168_v9, -inf  ;;  %v2182_v12 = vadd.f32 %v2114_v38, %v787_v40 }
 0x25b   :  { %848 = vmax.xlane.f32.xlu0 %v847_v56  ;;  %863 = vmax.xlane.f32.xlu1 %v862_v62  ;;  %v2192_v4 = vadd.f32 %v2114_v38, %v785_v52  ;;  %v856_v8 = vsel %vm831_vm1, %v2179_v59, -inf  ;;  %v1090_v55 = vmul.f32 1.442695, %v2188_v31  ;;  %v2248_v56 = vsub.f32 %v2075_v15, %v1050_v23 }
 0x25c   :  { %v865_v44 = vsel %vm831_vm1, %v2182_v12, -inf  ;;  %v1059_v40 = vpop.xlane.xlu0 %1058  ;;  %v2252_v62 = vmul.f32 %v2099_v28, %v2112_v36 }
 0x25d   :  { %v1411_v32 = vpop.f32.mrb[12].mxu1  ;;  %v859_v20 = vsel %vm831_vm1, %v2192_v4, -inf  ;;  %1522 = vpow2.f32 %v1090_v55  ;;  %v2270_v14 = vsub.f32 %v2078_v16, %v1059_v40 }
 0x25e   :  { %v790_v5 = vmul.f32 %v1411_v32, %v2118_v48  ;;  %v456_v7 = vpop.f32.mrb[13].mxu1 }
 0x25f   :  { %v788_v57 = vmul.f32 %v2093_v22, %v456_v7  ;;  %857 = vmax.xlane.f32.xlu1 %v856_v8  ;;  %866 = vmax.xlane.f32.xlu0 %v865_v44  ;;  %v1412_v54 = vpop.f32.mrb[14].mxu1  ;;  %v2210_v22 = vsub.f32 %v2047_v1, %v1038_v60  ;;  %v1094_v1 = vmul.f32 1.442695, %v2201_v10  ;;  %v1069_v8 = vsel %vm831_vm1, %v2252_v62, -inf }
 0x260   :  { %v791_v51 = vmul.f32 %v1412_v54, %v2112_v36  ;;  %v459_v49 = vpop.f32.mrb[15].mxu1  ;;  %v2206_v17 = vadd.f32 %v2114_v38, %v790_v5  ;;  %v1053_v15 = vpop.xlane.xlu0 %1052  ;;  %v1104_v36 = vmul.f32 1.442695, %v2248_v56  ;;  %v1110_v16 = vmul.f32 1.442695, %v2270_v14 }
 0x261   :  { %v789_v34 = vmul.f32 %v2097_v26, %v459_v49  ;;  %v2218_v58 = vadd.f32 %v2114_v38, %v788_v57  ;;  %v2228_v26 = vsub.f32 %v2057_v6, %v1041_v13  ;;  %v1096_v37 = vmul.f32 1.442695, %v2210_v22  ;;  %v1062_v5 = vpop.xlane.xlu1 %1061 }
 0x262   :  { %v874_v25 = vsel %vm831_vm1, %v2206_v17, -inf  ;;  %v2221_v42 = vadd.f32 %v2114_v38, %v791_v51  ;;  %1524 = vpow2.f32 %v1094_v1  ;;  %v2243_v6 = vsub.f32 %v2052_v35, %v1047_v53  ;;  %v1519_v53 = vpop.eup %1518 }
 0x263   :  { %860 = vmax.xlane.f32.xlu0 %v859_v20  ;;  %875 = vmax.xlane.f32.xlu1 %v874_v25  ;;  %v868_v43 = vsel %vm831_vm1, %v2218_v58, -inf  ;;  %v2240_v0 = vadd.f32 %v2114_v38, %v789_v34  ;;  %v1098_v48 = vmul.f32 1.442695, %v2228_v26  ;;  %1526 = vpow2.f32 %v1096_v37  ;;  %v1521_v32 = vpop.eup %1520 }
 0x264   :  { %v877_v52 = vsel %vm831_vm1, %v2221_v42, -inf  ;;  %v1066_v38 = vsel %vm831_vm1, %v2233_v39, -inf  ;;  %v1102_v60 = vmul.f32 1.442695, %v2243_v6  ;;  %1528 = vpow2.f32 %v1100_v21  ;;  %v1065_v13 = vpop.xlane.xlu0 %1064 }
 0x265   :  { %v871_v35 = vsel %vm831_vm1, %v2240_v0, -inf  ;;  %1530 = vpow2.f32 %v1098_v48  ;;  %v2263_v28 = vsub.f32 %v2083_v18, %v1053_v15  ;;  %v1120_v7 = vsel %vm831_vm1, %v1519_v53, 0.0 }
 0x266   :  { %1532 = vpow2.f32 %v1102_v60  ;;  %v1108_v57 = vmul.f32 1.442695, %v2260_v63  ;;  %v2275_v54 = vsub.f32 %v2102_v29, %v1062_v5  ;;  %v1126_v51 = vsel %vm831_vm1, %v1521_v32, 0.0 }
 0x267   :  { %869 = vmax.xlane.f32.xlu1 %v868_v43  ;;  %878 = vmax.xlane.f32.xlu0 %v877_v52  ;;  %v1523_v44 = vpop.eup %1522  ;;  %v1106_v18 = vmul.f32 1.442695, %v2263_v28  ;;  %1534 = vpow2.f32 %v1104_v36  ;;  %v2281_v20 = vsub.f32 %v2105_v61, %v1065_v13 }
 0x268   :  { %v1123_v49 = vsel %vm831_vm1, %v1523_v44, 0.0  ;;  %1536 = vpow2.f32 %v1108_v57  ;;  %v1112_v50 = vmul.f32 1.442695, %v2275_v54 }
 0x269   :  { %1538 = vpow2.f32 %v1106_v18  ;;  %v1114_v37 = vmul.f32 1.442695, %v2281_v20 }
 0x26a   :  { %1540 = vpow2.f32 %v1110_v16 }
 0x26b   :  { %1067 = vmax.xlane.f32.xlu1 %v1066_v38  ;;  %872 = vmax.xlane.f32.xlu0 %v871_v35  ;;  %1542 = vpow2.f32 %v1112_v50 }
 0x26c   :  { %v1525_v11 = vpop.eup %1524  ;;  %1544 = vpow2.f32 %v1114_v37 }
 0x26d   :  { %v1527_v55 = vpop.eup %1526  ;;  %v1129_v25 = vsel %vm831_vm1, %v1525_v11, 0.0 }
 0x26e   :  { %v1529_v29 = vpop.eup %1528  ;;  %v1132_v34 = vsel %vm831_vm1, %v1527_v55, 0.0 }
 0x26f   :  { %1121 = vadd.xlane.f32.xlu1 %v1120_v7  ;;  %1070 = vmax.xlane.f32.xlu0 %v1069_v8  ;;  %v1531_v1 = vpop.eup %1530  ;;  %v1138_v43 = vsel %vm831_vm1, %v1529_v29, 0.0 }
 0x270   :  { %v1533_v40 = vpop.eup %1532  ;;  %v1135_v61 = vsel %vm831_vm1, %v1531_v1, 0.0 }
 0x271   :  { %v1535_v52 = vpop.eup %1534  ;;  %v1141_v48 = vsel %vm831_vm1, %v1533_v40, 0.0 }
 0x272   :  { %v1537_v21 = vpop.eup %1536  ;;  %v1144_v23 = vsel %vm831_vm1, %v1535_v52, 0.0 }
 0x273   :  { %1127 = vadd.xlane.f32.xlu1 %v1126_v51  ;;  %1124 = vadd.xlane.f32.xlu0 %v1123_v49  ;;  %v1539_v38 = vpop.eup %1538  ;;  %v1150_v53 = vsel %vm831_vm1, %v1537_v21, 0.0 }
 0x274   :  { %v1541_v35 = vpop.eup %1540  ;;  %v1147_v60 = vsel %vm831_vm1, %v1539_v38, 0.0 }
 0x275   :  { %v1543_v15 = vpop.eup %1542  ;;  %v1153_v32 = vsel %vm831_vm1, %v1541_v35, 0.0 }
 0x276   :  { %v1156_v36 = vsel %vm831_vm1, %v1543_v15, 0.0  ;;  %v1545_v5 = vpop.eup %1544 }
 0x277   :  { %1133 = vadd.xlane.f32.xlu1 %v1132_v34  ;;  %1130 = vadd.xlane.f32.xlu0 %v1129_v25  ;;  %v1159_v7 = vsel %vm831_vm1, %v1545_v5, 0.0 }
 0x27b   :  { %1139 = vadd.xlane.f32.xlu1 %v1138_v43  ;;  %1136 = vadd.xlane.f32.xlu0 %v1135_v61 }
 0x27f   :  { %1145 = vadd.xlane.f32.xlu1 %v1144_v23  ;;  %1142 = vadd.xlane.f32.xlu0 %v1141_v48 }
 0x283   :  { %1151 = vadd.xlane.f32.xlu1 %v1150_v53  ;;  %1148 = vadd.xlane.f32.xlu0 %v1147_v60 }
 0x287   :  { %1157 = vadd.xlane.f32.xlu1 %v1156_v36  ;;  %1154 = vadd.xlane.f32.xlu0 %v1153_v32 }
 0x28b   :  { %1160 = vadd.xlane.f32.xlu0 %v1159_v7 }
 0x2d8   :  { %v840_v8 = vpop.xlane.xlu0 %839 }
 0x2d9   :  { %v2297_v44 = vsub.f32 %v2121_v3, %v840_v8 }
 0x2db   :  { %v900_v57 = vmul.f32 1.442695, %v2297_v44  ;;  %v837_v18 = vpop.xlane.xlu1 %836 }
 0x2dc   :  { %v834_v11 = vpop.xlane.xlu0 %833  ;;  %v2304_v51 = vsub.f32 %v2131_v24, %v837_v18 }
 0x2dd   :  { %1546 = vpow2.f32 %v900_v57  ;;  %v2301_v13 = vsub.f32 %v2128_v27, %v834_v11 }
 0x2de   :  { %v898_v29 = vmul.f32 1.442695, %v2304_v51 }
 0x2df   :  { %v896_v49 = vmul.f32 1.442695, %v2301_v13 }
 0x2e0   :  { %v843_v55 = vpop.xlane.xlu0 %842  ;;  %v852_v16 = vpop.xlane.xlu1 %851 }
 0x2e1   :  { %1548 = vpow2.f32 %v896_v49  ;;  %v2308_v50 = vsub.f32 %v2136_v2, %v843_v55  ;;  %v2311_v3 = vsub.f32 %v2144_v47, %v852_v16 }
 0x2e3   :  { %v902_v34 = vmul.f32 1.442695, %v2308_v50  ;;  %v908_v27 = vmul.f32 1.442695, %v2311_v3 }
 0x2e4   :  { %v846_v25 = vpop.xlane.xlu1 %845  ;;  %v855_v24 = vpop.xlane.xlu0 %854 }
 0x2e5   :  { %1550 = vpow2.f32 %v902_v34  ;;  %v2317_v1 = vsub.f32 %v2152_v19, %v846_v25  ;;  %v2320_v37 = vsub.f32 %v2155_v41, %v855_v24 }
 0x2e6   :  { %1552 = vpow2.f32 %v908_v27 }
 0x2e7   :  { %v1547_v2 = vpop.eup %1546  ;;  %1554 = vpow2.f32 %v898_v29  ;;  %v904_v47 = vmul.f32 1.442695, %v2317_v1  ;;  %v910_v40 = vmul.f32 1.442695, %v2320_v37 }
 0x2e8   :  { %v849_v43 = vpop.xlane.xlu0 %848  ;;  %v864_v61 = vpop.xlane.xlu1 %863  ;;  %v934_v52 = vsel %vm831_vm1, %v1547_v2, 0.0 }
 0x2e9   :  { %1556 = vpow2.f32 %v904_v47  ;;  %v2326_v21 = vsub.f32 %v2163_v33, %v849_v43  ;;  %v2329_v19 = vsub.f32 %v2168_v9, %v864_v61  ;;  %935 = vadd.xlane.f32.xlu1 %v934_v52 }
 0x2ea   :  { %1558 = vpow2.f32 %v910_v40 }
 0x2eb   :  { %v1549_v41 = vpop.eup %1548  ;;  %v906_v23 = vmul.f32 1.442695, %v2326_v21  ;;  %v916_v48 = vmul.f32 1.442695, %v2329_v19 }
 0x2ec   :  { %v858_v38 = vpop.xlane.xlu1 %857  ;;  %v867_v35 = vpop.xlane.xlu0 %866  ;;  %v928_v53 = vsel %vm831_vm1, %v1549_v41, 0.0 }
 0x2ed   :  { %v2335_v60 = vsub.f32 %v2179_v59, %v858_v38  ;;  %v2338_v33 = vsub.f32 %v2182_v12, %v867_v35  ;;  %929 = vadd.xlane.f32.xlu1 %v928_v53  ;;  %1560 = vpow2.f32 %v916_v48 }
 0x2ee   :  { %1562 = vpow2.f32 %v906_v23 }
 0x2ef   :  { %v1551_v9 = vpop.eup %1550  ;;  %v912_v15 = vmul.f32 1.442695, %v2335_v60  ;;  %v918_v36 = vmul.f32 1.442695, %v2338_v33 }
 0x2f0   :  { %v1553_v32 = vpop.eup %1552  ;;  %v861_v5 = vpop.xlane.xlu0 %860  ;;  %v937_v8 = vsel %vm831_vm1, %v1551_v9, 0.0 }
 0x2f1   :  { %v876_v7 = vpop.xlane.xlu1 %875  ;;  %v1555_v57 = vpop.eup %1554  ;;  %1564 = vpow2.f32 %v912_v15  ;;  %v2344_v59 = vsub.f32 %v2192_v4, %v861_v5  ;;  %v946_v18 = vsel %vm831_vm1, %v1553_v32, 0.0  ;;  %938 = vadd.xlane.f32.xlu0 %v937_v8 }
 0x2f2   :  { %v2347_v12 = vsub.f32 %v2206_v17, %v876_v7  ;;  %947 = vadd.xlane.f32.xlu1 %v946_v18  ;;  %1566 = vpow2.f32 %v918_v36  ;;  %v931_v4 = vsel %vm831_vm1, %v1555_v57, 0.0 }
 0x2f3   :  { %v1557_v11 = vpop.eup %1556  ;;  %v914_v49 = vmul.f32 1.442695, %v2344_v59 }
 0x2f4   :  { %v924_v55 = vmul.f32 1.442695, %v2347_v12  ;;  %v879_v29 = vpop.xlane.xlu0 %878  ;;  %v940_v34 = vsel %vm831_vm1, %v1557_v11, 0.0  ;;  %v1559_v27 = vpop.eup %1558 }
 0x2f5   :  { %v870_v16 = vpop.xlane.xlu1 %869  ;;  %v2358_v25 = vsub.f32 %v2221_v42, %v879_v29  ;;  %932 = vadd.xlane.f32.xlu0 %v931_v4  ;;  %v949_v61 = vsel %vm831_vm1, %v1559_v27, 0.0 }
 0x2f6   :  { %v2355_v17 = vsub.f32 %v2218_v58, %v870_v16  ;;  %1568 = vpow2.f32 %v924_v55  ;;  %941 = vadd.xlane.f32.xlu1 %v940_v34 }
 0x2f7   :  { %1570 = vpow2.f32 %v914_v49  ;;  %v926_v2 = vmul.f32 1.442695, %v2358_v25  ;;  %v1561_v47 = vpop.eup %1560 }
 0x2f8   :  { %v920_v24 = vmul.f32 1.442695, %v2355_v17  ;;  %v873_v43 = vpop.xlane.xlu0 %872  ;;  %v1563_v52 = vpop.eup %1562  ;;  %v958_v41 = vsel %vm831_vm1, %v1561_v47, 0.0 }
 0x2f9   :  { %v1068_v40 = vpop.xlane.xlu1 %1067  ;;  %v2367_v42 = vsub.f32 %v2240_v0, %v873_v43  ;;  %950 = vadd.xlane.f32.xlu0 %v949_v61 }
 0x2fa   :  { %1572 = vpow2.f32 %v920_v24  ;;  %v2364_v58 = vsub.f32 %v2233_v39, %v1068_v40  ;;  %959 = vadd.xlane.f32.xlu1 %v958_v41  ;;  %v943_v39 = vsel %vm831_vm1, %v1563_v52, 0.0 }
 0x2fb   :  { %v1565_v23 = vpop.eup %1564  ;;  %1574 = vpow2.f32 %v926_v2  ;;  %v922_v38 = vmul.f32 1.442695, %v2367_v42 }
 0x2fc   :  { %v1116_v48 = vmul.f32 1.442695, %v2364_v58  ;;  %v1071_v53 = vpop.xlane.xlu0 %1070  ;;  %v952_v9 = vsel %vm831_vm1, %v1565_v23, 0.0  ;;  %v1567_v15 = vpop.eup %1566 }
 0x2fd   :  { %v1122_v35 = vpop.xlane.xlu1 %1121  ;;  %v2375_v0 = vsub.f32 %v2252_v62, %v1071_v53  ;;  %944 = vadd.xlane.f32.xlu0 %v943_v39  ;;  %v961_v8 = vsel %vm831_vm1, %v1567_v15, 0.0 }
 0x2fe   :  { %1576 = vpow2.f32 %v1116_v48  ;;  %953 = vadd.xlane.f32.xlu1 %v952_v9 }
 0x2ff   :  { %1578 = vpow2.f32 %v922_v38  ;;  %v1118_v36 = vmul.f32 1.442695, %v2375_v0 }
 0x300   :  { %1580 = vlog2.f32 %v1122_v35  ;;  %v1569_v32 = vpop.eup %1568  ;;  %v1125_v7 = vpop.xlane.xlu0 %1124 }
 0x301   :  { %v1128_v5 = vpop.xlane.xlu1 %1127  ;;  %v1571_v57 = vpop.eup %1570  ;;  %1582 = vpow2.f32 %v1118_v36  ;;  %v970_v18 = vsel %vm831_vm1, %v1569_v32, 0.0  ;;  %962 = vadd.xlane.f32.xlu0 %v961_v8 }
 0x302   :  { %1584 = vlog2.f32 %v1128_v5  ;;  %971 = vadd.xlane.f32.xlu1 %v970_v18  ;;  %v955_v16 = vsel %vm831_vm1, %v1571_v57, 0.0 }
 0x303   :  { %1586 = vlog2.f32 %v1125_v7 }
 0x304   :  { %v1573_v62 = vpop.eup %1572  ;;  %v1131_v49 = vpop.xlane.xlu0 %1130 }
 0x305   :  { %v1134_v11 = vpop.xlane.xlu1 %1133  ;;  %v964_v55 = vsel %vm831_vm1, %v1573_v62, 0.0  ;;  %v1575_v29 = vpop.eup %1574  ;;  %956 = vadd.xlane.f32.xlu0 %v955_v16 }
 0x306   :  { %1588 = vlog2.f32 %v1134_v11  ;;  %965 = vadd.xlane.f32.xlu1 %v964_v55  ;;  %v973_v47 = vsel %vm831_vm1, %v1575_v29, 0.0 }
 0x307   :  { %1590 = vlog2.f32 %v1131_v49 }
 0x308   :  { %v1577_v34 = vpop.eup %1576  ;;  %v1137_v24 = vpop.xlane.xlu0 %1136 }
 0x309   :  { %v1579_v4 = vpop.eup %1578  ;;  %v1140_v27 = vpop.xlane.xlu1 %1139  ;;  %v1162_v2 = vsel %vm831_vm1, %v1577_v34, 0.0  ;;  %974 = vadd.xlane.f32.xlu0 %v973_v47 }
 0x30a   :  { %v1581_v40 = vpop.eup %1580  ;;  %1592 = vlog2.f32 %v1140_v27  ;;  %1163 = vadd.xlane.f32.xlu1 %v1162_v2  ;;  %v967_v38 = vsel %vm831_vm1, %v1579_v4, 0.0 }
 0x30b   :  { %v1169_v43 = vmul.f32 0.6931472, %v1581_v40  ;;  %1594 = vlog2.f32 %v1137_v24  ;;  %v1583_v61 = vpop.eup %1582 }
 0x30c   :  { %v1585_v52 = vpop.eup %1584  ;;  %v1143_v48 = vpop.xlane.xlu0 %1142  ;;  %v1165_v8 = vsel %vm831_vm1, %v1583_v61, 0.0 }
 0x30d   :  { %v1200_v41 = vsub.f32 %v2171_v45, %v1169_v43  ;;  %v1146_v23 = vpop.xlane.xlu1 %1145  ;;  %v1587_v35 = vpop.eup %1586  ;;  %v1173_v53 = vmul.f32 0.6931472, %v1585_v52  ;;  %968 = vadd.xlane.f32.xlu0 %v967_v38 }
 0x30e   :  { %1596 = vlog2.f32 %v1146_v23  ;;  %v1171_v9 = vmul.f32 0.6931472, %v1587_v35 }
 0x30f   :  { %1232 = vst.msk [vmem:[#allocation14] sm:$0xff] %vm831_vm1, %v1200_v41  ;;  %1598 = vlog2.f32 %v1143_v48  ;;  %v1202_v15 = vsub.f32 %v2185_v46, %v1173_v53 }
 0x310   :  { %v1589_v39 = vpop.eup %1588  ;;  %v1201_v32 = vsub.f32 %v2188_v31, %v1171_v9  ;;  %v1149_v7 = vpop.xlane.xlu0 %1148 }
 0x311   :  { %v1591_v36 = vpop.eup %1590  ;;  %v1177_v5 = vmul.f32 0.6931472, %v1589_v39  ;;  %v1152_v45 = vpop.xlane.xlu1 %1151  ;;  %1234 = vst.msk [vmem:[#allocation14 + $0x10] sm:$0xff] %vm831_vm1, %v1202_v15  ;;  %1166 = vadd.xlane.f32.xlu0 %v1165_v8 }
 0x312   :  { %v1175_v57 = vmul.f32 0.6931472, %v1591_v36  ;;  %1600 = vlog2.f32 %v1152_v45  ;;  %1233 = vst.msk [vmem:[#allocation14 + $0x8] sm:$0xff] %vm831_vm1, %v1201_v32 }
 0x313   :  { %v1204_v18 = vsub.f32 %v2210_v22, %v1177_v5  ;;  %1602 = vlog2.f32 %v1149_v7 }
 0x314   :  { %v1593_v62 = vpop.eup %1592  ;;  %v1203_v46 = vsub.f32 %v2201_v10, %v1175_v57  ;;  %v1155_v55 = vpop.xlane.xlu0 %1154 }
 0x315   :  { %v1595_v11 = vpop.eup %1594  ;;  %1236 = vst.msk [vmem:[#allocation14 + $0x20] sm:$0xff] %vm831_vm1, %v1204_v18  ;;  %v1181_v31 = vmul.f32 0.6931472, %v1593_v62  ;;  %v1158_v49 = vpop.xlane.xlu1 %1157 }
 0x316   :  { %1235 = vst.msk [vmem:[#allocation14 + $0x18] sm:$0xff] %vm831_vm1, %v1203_v46  ;;  %v1179_v16 = vmul.f32 0.6931472, %v1595_v11  ;;  %1604 = vlog2.f32 %v1158_v49 }
 0x317   :  { %v1206_v29 = vsub.f32 %v2225_v30, %v1181_v31  ;;  %1606 = vlog2.f32 %v1155_v55 }
 0x318   :  { %v1597_v34 = vpop.eup %1596  ;;  %v1205_v22 = vsub.f32 %v2228_v26, %v1179_v16  ;;  %v1161_v27 = vpop.xlane.xlu0 %1160 }
 0x319   :  { %v1599_v4 = vpop.eup %1598  ;;  %1238 = vst.msk [vmem:[#allocation14 + $0x30] sm:$0xff] %vm831_vm1, %v1206_v29  ;;  %v1185_v10 = vmul.f32 0.6931472, %v1597_v34  ;;  %1608 = vlog2.f32 %v1161_v27 }
 0x31a   :  { %1237 = vst.msk [vmem:[#allocation14 + $0x28] sm:$0xff] %vm831_vm1, %v1205_v22  ;;  %v1183_v24 = vmul.f32 0.6931472, %v1599_v4 }
 0x31b   :  { %v1208_v2 = vsub.f32 %v2248_v56, %v1185_v10 }
 0x31c   :  { %v1601_v47 = vpop.eup %1600  ;;  %v1207_v40 = vsub.f32 %v2243_v6, %v1183_v24 }
 0x31d   :  { %v1603_v43 = vpop.eup %1602  ;;  %1240 = vst.msk [vmem:[#allocation14 + $0x40] sm:$0xff] %vm831_vm1, %v1208_v2  ;;  %v1189_v30 = vmul.f32 0.6931472, %v1601_v47 }
 0x31e   :  { %1239 = vst.msk [vmem:[#allocation14 + $0x38] sm:$0xff] %vm831_vm1, %v1207_v40  ;;  %v1187_v26 = vmul.f32 0.6931472, %v1603_v43 }
 0x31f   :  { %v1210_v61 = vsub.f32 %v2260_v63, %v1189_v30 }
 0x320   :  { %v1605_v52 = vpop.eup %1604  ;;  %v1209_v41 = vsub.f32 %v2263_v28, %v1187_v26 }
 0x321   :  { %v1607_v23 = vpop.eup %1606  ;;  %1242 = vst.msk [vmem:[#allocation14 + $0x50] sm:$0xff] %vm831_vm1, %v1210_v61  ;;  %v1193_v48 = vmul.f32 0.6931472, %v1605_v52 }
 0x322   :  { %1241 = vst.msk [vmem:[#allocation14 + $0x48] sm:$0xff] %vm831_vm1, %v1209_v41  ;;  %v1191_v56 = vmul.f32 0.6931472, %v1607_v23 }
 0x323   :  { %v1212_v6 = vsub.f32 %v2275_v54, %v1193_v48  ;;  %v1609_v38 = vpop.eup %1608 }
 0x324   :  { %v1211_v35 = vsub.f32 %v2270_v14, %v1191_v56  ;;  %v1195_v53 = vmul.f32 0.6931472, %v1609_v38 }
 0x325   :  { %1244 = vst.msk [vmem:[#allocation14 + $0x60] sm:$0xff] %vm831_vm1, %v1212_v6 }
 0x326   :  { %1243 = vst.msk [vmem:[#allocation14 + $0x58] sm:$0xff] %vm831_vm1, %v1211_v35  ;;  %v1213_v63 = vsub.f32 %v2281_v20, %v1195_v53 }
 0x328   :  { %1245 = vst.msk [vmem:[#allocation14 + $0x68] sm:$0xff] %vm831_vm1, %v1213_v63 }
 0x376   :  { %v936_v28 = vpop.xlane.xlu1 %935 }
 0x377   :  { %1610 = vlog2.f32 %v936_v28 }
 0x37a   :  { %v930_v9 = vpop.xlane.xlu1 %929 }
 0x37b   :  { %1612 = vlog2.f32 %v930_v9 }
 0x37e   :  { %v939_v39 = vpop.xlane.xlu0 %938 }
 0x37f   :  { %v948_v15 = vpop.xlane.xlu1 %947  ;;  %1614 = vlog2.f32 %v939_v39 }
 0x380   :  { %1616 = vlog2.f32 %v948_v15 }
 0x381   :  { %v1611_v54 = vpop.eup %1610 }
 0x382   :  { %v981_v36 = vmul.f32 0.6931472, %v1611_v54  ;;  %v933_v14 = vpop.xlane.xlu0 %932 }
 0x383   :  { %v942_v32 = vpop.xlane.xlu1 %941  ;;  %1618 = vlog2.f32 %v933_v14 }
 0x384   :  { %v1010_v5 = vsub.f32 %v2297_v44, %v981_v36  ;;  %1620 = vlog2.f32 %v942_v32 }
 0x385   :  { %v1613_v45 = vpop.eup %1612 }
 0x386   :  { %1218 = vst.msk [vmem:[#allocation13 + $0x10] sm:$0xff] %vm831_vm1, %v1010_v5  ;;  %v977_v20 = vmul.f32 0.6931472, %v1613_v45  ;;  %v951_v7 = vpop.xlane.xlu0 %950 }
 0x387   :  { %v960_v8 = vpop.xlane.xlu1 %959  ;;  %1622 = vlog2.f32 %v951_v7 }
 0x388   :  { %v1008_v57 = vsub.f32 %v2301_v13, %v977_v20  ;;  %1624 = vlog2.f32 %v960_v8 }
 0x389   :  { %v1615_v18 = vpop.eup %1614 }
 0x38a   :  { %v1617_v62 = vpop.eup %1616  ;;  %1216 = vst.msk [vmem:[#allocation13] sm:$0xff] %vm831_vm1, %v1008_v57  ;;  %v983_v46 = vmul.f32 0.6931472, %v1615_v18  ;;  %v945_v11 = vpop.xlane.xlu0 %944 }
 0x38b   :  { %v989_v31 = vmul.f32 0.6931472, %v1617_v62  ;;  %v954_v49 = vpop.xlane.xlu1 %953  ;;  %1626 = vlog2.f32 %v945_v11 }
 0x38c   :  { %v1011_v44 = vsub.f32 %v2308_v50, %v983_v46  ;;  %1628 = vlog2.f32 %v954_v49 }
 0x38d   :  { %v1619_v55 = vpop.eup %1618  ;;  %v1014_v16 = vsub.f32 %v2311_v3, %v989_v31 }
 0x38e   :  { %v1621_v29 = vpop.eup %1620  ;;  %1219 = vst.msk [vmem:[#allocation13 + $0x18] sm:$0xff] %vm831_vm1, %v1011_v44  ;;  %v979_v13 = vmul.f32 0.6931472, %v1619_v55  ;;  %v963_v34 = vpop.xlane.xlu0 %962 }
 0x38f   :  { %1222 = vst.msk [vmem:[#allocation13 + $0x30] sm:$0xff] %vm831_vm1, %v1014_v16  ;;  %v985_v22 = vmul.f32 0.6931472, %v1621_v29  ;;  %v972_v4 = vpop.xlane.xlu1 %971  ;;  %1630 = vlog2.f32 %v963_v34 }
 0x390   :  { %v1009_v10 = vsub.f32 %v2304_v51, %v979_v13  ;;  %1632 = vlog2.f32 %v972_v4 }
 0x391   :  { %v1623_v27 = vpop.eup %1622  ;;  %v1012_v50 = vsub.f32 %v2317_v1, %v985_v22 }
 0x392   :  { %v1625_v24 = vpop.eup %1624  ;;  %1217 = vst.msk [vmem:[#allocation13 + $0x8] sm:$0xff] %vm831_vm1, %v1009_v10  ;;  %v991_v3 = vmul.f32 0.6931472, %v1623_v27  ;;  %v957_v2 = vpop.xlane.xlu0 %956 }
 0x393   :  { %1220 = vst.msk [vmem:[#allocation13 + $0x20] sm:$0xff] %vm831_vm1, %v1012_v50  ;;  %v997_v47 = vmul.f32 0.6931472, %v1625_v24  ;;  %v966_v40 = vpop.xlane.xlu1 %965  ;;  %1634 = vlog2.f32 %v957_v2 }
 0x394   :  { %v1015_v43 = vsub.f32 %v2320_v37, %v991_v3  ;;  %1636 = vlog2.f32 %v966_v40 }
 0x395   :  { %v1627_v30 = vpop.eup %1626  ;;  %v1018_v51 = vsub.f32 %v2329_v19, %v997_v47 }
 0x396   :  { %v1629_v26 = vpop.eup %1628  ;;  %1223 = vst.msk [vmem:[#allocation13 + $0x38] sm:$0xff] %vm831_vm1, %v1015_v43  ;;  %v987_v1 = vmul.f32 0.6931472, %v1627_v30  ;;  %v975_v61 = vpop.xlane.xlu0 %974 }
 0x397   :  { %1226 = vst.msk [vmem:[#allocation13 + $0x50] sm:$0xff] %vm831_vm1, %v1018_v51  ;;  %v993_v52 = vmul.f32 0.6931472, %v1629_v26  ;;  %v1164_v41 = vpop.xlane.xlu1 %1163  ;;  %1638 = vlog2.f32 %v975_v61 }
 0x398   :  { %v1013_v23 = vsub.f32 %v2326_v21, %v987_v1  ;;  %1640 = vlog2.f32 %v1164_v41 }
 0x399   :  { %v1631_v48 = vpop.eup %1630  ;;  %v1016_v37 = vsub.f32 %v2335_v60, %v993_v52 }
 0x39a   :  { %v1633_v56 = vpop.eup %1632  ;;  %1221 = vst.msk [vmem:[#allocation13 + $0x28] sm:$0xff] %vm831_vm1, %v1013_v23  ;;  %v999_v19 = vmul.f32 0.6931472, %v1631_v48  ;;  %v969_v6 = vpop.xlane.xlu0 %968 }
 0x39b   :  { %1224 = vst.msk [vmem:[#allocation13 + $0x40] sm:$0xff] %vm831_vm1, %v1016_v37  ;;  %v1005_v38 = vmul.f32 0.6931472, %v1633_v56  ;;  %1642 = vlog2.f32 %v969_v6 }
 0x39c   :  { %v1019_v35 = vsub.f32 %v2338_v33, %v999_v19 }
 0x39d   :  { %v1635_v53 = vpop.eup %1634  ;;  %v1022_v63 = vsub.f32 %v2347_v12, %v1005_v38 }
 0x39e   :  { %v1637_v28 = vpop.eup %1636  ;;  %1227 = vst.msk [vmem:[#allocation13 + $0x58] sm:$0xff] %vm831_vm1, %v1019_v35  ;;  %v995_v21 = vmul.f32 0.6931472, %v1635_v53  ;;  %v1167_v9 = vpop.xlane.xlu0 %1166 }
 0x39f   :  { %1230 = vst.msk [vmem:[#allocation13 + $0x70] sm:$0xff] %vm831_vm1, %v1022_v63  ;;  %v1001_v60 = vmul.f32 0.6931472, %v1637_v28  ;;  %1644 = vlog2.f32 %v1167_v9 }
 0x3a0   :  { %v1017_v39 = vsub.f32 %v2344_v59, %v995_v21 }
 0x3a1   :  { %v1639_v15 = vpop.eup %1638  ;;  %v1020_v54 = vsub.f32 %v2355_v17, %v1001_v60 }
 0x3a2   :  { %v1641_v36 = vpop.eup %1640  ;;  %1225 = vst.msk [vmem:[#allocation13 + $0x48] sm:$0xff] %vm831_vm1, %v1017_v39  ;;  %v1007_v33 = vmul.f32 0.6931472, %v1639_v15 }
 0x3a3   :  { %1228 = vst.msk [vmem:[#allocation13 + $0x60] sm:$0xff] %vm831_vm1, %v1020_v54  ;;  %v1197_v12 = vmul.f32 0.6931472, %v1641_v36 }
 0x3a4   :  { %v1023_v14 = vsub.f32 %v2358_v25, %v1007_v33 }
 0x3a5   :  { %v1643_v32 = vpop.eup %1642  ;;  %v1214_v5 = vsub.f32 %v2364_v58, %v1197_v12 }
 0x3a6   :  { %1231 = vst.msk [vmem:[#allocation13 + $0x78] sm:$0xff] %vm831_vm1, %v1023_v14  ;;  %v1003_v59 = vmul.f32 0.6931472, %v1643_v32 }
 0x3a7   :  { %1246 = vst.msk [vmem:[#allocation14 + $0x70] sm:$0xff] %vm831_vm1, %v1214_v5 }
 0x3a8   :  { %v1021_v17 = vsub.f32 %v2367_v42, %v1003_v59 }
 0x3a9   :  { %v1645_v45 = vpop.eup %1644 }
 0x3aa   :  { %1229 = vst.msk [vmem:[#allocation13 + $0x68] sm:$0xff] %vm831_vm1, %v1021_v17  ;;  %v1199_v20 = vmul.f32 0.6931472, %v1645_v45 }
 0x3ab   :  { %1789 = shalt.err (!%p1786_p10)
}
 0x3ac   :  { %s1790_s14 = scalar_lea.hbm %s2486_s6, 2048 }
 0x3ad   :  { %p1791_p11 = scmp.ne.s32.totalorder %s2486_s6, %s1790_s14  ;;  %p1794_p12 = scmp.lt.u32.totalorder %s1790_s14, %s2486_s6 }
 0x3af   :  { %p1796_p13 = pnand %p1794_p12, %p1791_p11 }
 0x3b1   :  { %1799 = shalt.err (!%p1796_p13)
}
 0x3b2   :  { %1259 = dma.vmem_to_hbm [thread:$0]  %s1254_s25, 2048, %s2486_s6, [#allocation4], %s1835_s11, %s1835_s11, %s1836_s12   ;;  %v1215_v25 = vsub.f32 %v2375_v0, %v1199_v20 }
 0x3b3   :  { %s1800_s20 = scalar_lea.vmem %s1266_s8, 2048  ;;  %p1805_p1 = scmp.lt.s32.totalorder %s1266_s8, %s1266_s8 }
 0x3b4   :  { %1247 = vst.msk [vmem:[#allocation14 + $0x78] sm:$0xff] %vm831_vm1, %v1215_v25  ;;  %p1801_p0 = scmp.ne.s32.totalorder %s1266_s8, %s1800_s20  ;;  %p1806_p2 = scmp.lt.s32.totalorder %s1800_s20, %s1800_s20 }
 0x3b6   :  { %p1807_p3 = por %p1806_p2, %p1805_p1 }
 0x3b8   :  { %p1808_p4 = pnand %p1807_p3, %p1801_p0 }
 0x3ba   :  { %1811 = shalt.err (!%p1808_p4)
}
 0x3bb   :  { %s1812_s24 = scalar_lea.hbm %s2487_s7, 2048 }
 0x3bc   :  { %p1813_p5 = scmp.ne.s32.totalorder %s2487_s7, %s1812_s24  ;;  %p1816_p6 = scmp.lt.u32.totalorder %s1812_s24, %s2487_s7 }
 0x3be   :  { %p1818_p7 = pnand %p1816_p6, %p1813_p5 }
 0x3c0   :  { %1821 = shalt.err (!%p1818_p7)
}
 0x3c1   :  { %1271 = dma.vmem_to_hbm [thread:$0]  %s1266_s8, 2048, %s2487_s7, [#allocation15], %s1835_s11, %s1835_s11, %s1836_s12  }
 0x3c2   :  { %1830 = dma.done.wait [#allocation4], 2048  }
 0x3c3   :  { %1831 = vsyncadd [#allocation4], 4294965248 }
 0x3c4   :  { %1832 = dma.done.wait [#allocation15], 2048  }
 0x3c5   :  { %1833 = vsyncadd [#allocation15], 4294965248 }
 0x3c6   :  { %1278 = vsyncpa [#allocation3], 1 }
 0x3c7   :  { %1279 = vsyncpa [#allocation6], 1 }
 0x3c8   :  { %1280 = vsyncpa [#allocation9], 1 }
 0x3c9   :  { %1281 = vsyncpa [#allocation12], 1 }
 0x3ca   :  { %1282 = vsyncpa [#allocation4], 1 }
 0x3cb   :  { %1283 = vsyncpa [#allocation15], 1 }

</bundles_post_ra>
